<compile_context>
chip_gen: v7x
topology: tpu7x:2x2x1
jax: 0.10.0
libtpu: 0.0.40
codegen_flags: <defaults>
</compile_context>

<pallas_src>
import jax
import jax.numpy as jnp
from jax.experimental import pallas as pl
from jax.experimental.pallas import tpu as pltpu


# ---------------------------------------------------------------------------
# Pallas kernel
# ---------------------------------------------------------------------------
def _make_kernel(num_layers, hidden_units, t_chunk, seq_len):
    L, H, T = num_layers, hidden_units, t_chunk
    need_mask = (seq_len % T) != 0   # padded timesteps exist only if S % T != 0

    def kernel(*refs):
        # inputs
        xp_ref, h0_ref, c0_ref, whh0_ref = refs[0:4]
        pos = 4
        wih_refs, whh_refs, bias_refs = [], [], []
        for _ in range(L - 1):
            wih_refs.append(refs[pos])
            whh_refs.append(refs[pos + 1])
            bias_refs.append(refs[pos + 2])
            pos += 3
        w1_ref, b1_ref, w2_ref, b2_ref = refs[pos:pos + 4]
        # outputs
        out_ref, hn_ref, cn_ref = refs[pos + 4:pos + 7]
        # scratch (persists across grid steps)
        h_st, c_st = refs[pos + 7:pos + 9]

        t = pl.program_id(0)
        nprog = pl.num_programs(0)

        @pl.when(t == 0)
        def _():
            h_st[...] = h0_ref[...]
            c_st[...] = c0_ref[...]

        # Hoist only the recurrent state; weights stay as in-loop ref loads.
        hs = [h_st[l] for l in range(L)]
        cs = [c_st[l] for l in range(L)]

        def cell(gates, c_prev):
            # Single full-width sigmoid EUP pass; g-gate pre-activations were
            # pre-scaled by 2 in the wrapper so tanh(x) == 2*sigmoid(2x) - 1.
            sg = jax.nn.sigmoid(gates)
            i_g = sg[:, 0:H]
            f_g = sg[:, H:2 * H]
            g_g = 2.0 * sg[:, 2 * H:3 * H] - 1.0
            o_g = sg[:, 3 * H:4 * H]
            c_new = f_g * c_prev + i_g * g_g
            h_new = o_g * jnp.tanh(c_new)
            return h_new, c_new

        for tt in range(T):                       # unrolled chunk of timesteps
            if need_mask:
                valid = (t * T + tt) < seq_len    # scalar predicate (tail pad)
            x_in = None
            for l in range(L):
                if l == 0:
                    # layer 0: input projection precomputed outside the kernel
                    gates = xp_ref[tt] + jnp.dot(
                        hs[0], whh0_ref[...],
                        preferred_element_type=jnp.float32)
                else:
                    gates = (jnp.dot(x_in, wih_refs[l - 1][...],
                                     preferred_element_type=jnp.float32)
                             + jnp.dot(hs[l], whh_refs[l - 1][...],
                                       preferred_element_type=jnp.float32)
                             + bias_refs[l - 1][...])   # pre-broadcast (B,4H)
                h_new, c_new = cell(gates, cs[l])
                if need_mask:
                    h_new = jnp.where(valid, h_new, hs[l])
                    c_new = jnp.where(valid, c_new, cs[l])
                hs[l] = h_new
                cs[l] = c_new
                x_in = h_new                      # feeds next layer

        # state carry back once per chunk; redundant on the final chunk
        @pl.when(t < nprog - 1)
        def _():
            for l in range(L):
                h_st[l] = hs[l]
                c_st[l] = cs[l]

        @pl.when(t == nprog - 1)
        def _():
            for l in range(L):
                hn_ref[l] = hs[l]
                cn_ref[l] = cs[l]
            # head: linear -> relu -> fc on last timestep's top-layer h
            hid = (jnp.dot(hs[L - 1], w1_ref[...],
                           preferred_element_type=jnp.float32) + b1_ref[...])
            hid = jnp.maximum(hid, 0.0)
            out_ref[...] = (jnp.dot(hid, w2_ref[...],
                                    preferred_element_type=jnp.float32)
                            + b2_ref[...])        # lane-dense (B_pad, C_pad)

    return kernel


# ---------------------------------------------------------------------------
# Wrapper
# ---------------------------------------------------------------------------
def valina_lstm_forward(x, hidden, params, *, num_layers, hidden_units,
                        num_classes):
    """x: (B, S, F) batch-first, hidden = (h0, c0) each (L, B, H).

    params is torch-style: params["lstm"][l] = (w_ih, w_hh, b_ih, b_hh),
    params["head"] = (w1, b1, w2, b2).
    """
    h0, c0 = hidden
    B, S, _F = x.shape
    L, H, C = num_layers, hidden_units, num_classes
    f32 = jnp.float32

    B_pad = max(8, -(-B // 8) * 8)                # sublane-dense batch
    T = S if S <= 64 else 64                      # timesteps per grid step
    S_pad = -(-S // T) * T
    C_pad = -(-C // 128) * 128                    # lane-dense head output

    # tanh-as-sigmoid rewrite: scale the g-gate (candidate) pre-activation by 2
    def scale_g_w(w_t):                           # w_t: (in, 4H)
        return w_t.at[:, 2 * H:3 * H].multiply(2.0)

    def scale_g_b(b):                             # b: (4H,)
        return b.at[2 * H:3 * H].multiply(2.0)

    # -------- layer 0: precompute the input projection for ALL timesteps ----
    w_ih0, w_hh0, b_ih0, b_hh0 = params["lstm"][0]
    wih0_t = scale_g_w(w_ih0.T.astype(f32))                    # (F, 4H)
    whh0_t = scale_g_w(w_hh0.T.astype(f32))                    # (H, 4H)
    bias0 = scale_g_b((b_ih0 + b_hh0).astype(f32))             # (4H,)

    x_tm = jnp.transpose(x.astype(f32), (1, 0, 2))             # (S, B, F)
    xproj = jnp.einsum('sbf,fg->sbg', x_tm, wih0_t) + bias0    # (S, B, 4H)
    xproj = jnp.pad(xproj, ((0, S_pad - S), (0, B_pad - B), (0, 0)))

    h0_p = jnp.pad(h0.astype(f32), ((0, 0), (0, B_pad - B), (0, 0)))
    c0_p = jnp.pad(c0.astype(f32), ((0, 0), (0, B_pad - B), (0, 0)))

    def const_spec(shape):
        n = len(shape)
        return pl.BlockSpec(shape, lambda t, _n=n: (0,) * _n)

    args = [xproj, h0_p, c0_p, whh0_t]
    in_specs = [
        pl.BlockSpec((T, B_pad, 4 * H), lambda t: (t, 0, 0)),  # lane-dense DMA
        const_spec((L, B_pad, H)),
        const_spec((L, B_pad, H)),
        const_spec((H, 4 * H)),
    ]

    # layers >= 1: separate W_ih^T / W_hh^T (no per-step concat) + broadcast bias
    for l in range(1, L):
        w_ih, w_hh, b_ih, b_hh = params["lstm"][l]
        wih_t = scale_g_w(w_ih.T.astype(f32))                  # (H, 4H)
        whh_t = scale_g_w(w_hh.T.astype(f32))                  # (H, 4H)
        bias_b = jnp.broadcast_to(
            scale_g_b((b_ih + b_hh).astype(f32))[None, :], (B_pad, 4 * H))
        args += [wih_t, whh_t, bias_b]
        in_specs += [const_spec(wih_t.shape), const_spec(whh_t.shape),
                     const_spec(bias_b.shape)]

    w1, b1, w2, b2 = params["head"]
    w1_t = w1.T.astype(f32)                                            # (H, 128)
    b1_p = b1.astype(f32)[None, :]                                     # (1, 128)
    w2_t = jnp.pad(w2.T.astype(f32), ((0, 0), (0, C_pad - C)))         # (128, C_pad)
    b2_p = jnp.pad(b2.astype(f32)[None, :], ((0, 0), (0, C_pad - C)))  # (1, C_pad)
    args += [w1_t, b1_p, w2_t, b2_p]
    in_specs += [const_spec(w1_t.shape), const_spec(b1_p.shape),
                 const_spec(w2_t.shape), const_spec(b2_p.shape)]

    out_shapes = (
        jax.ShapeDtypeStruct((B_pad, C_pad), f32),
        jax.ShapeDtypeStruct((L, B_pad, H), f32),
        jax.ShapeDtypeStruct((L, B_pad, H), f32),
    )
    out_specs = [
        const_spec((B_pad, C_pad)),
        const_spec((L, B_pad, H)),
        const_spec((L, B_pad, H)),
    ]

    out_p, hn_p, cn_p = pl.pallas_call(
        _make_kernel(L, H, T, S),
        out_shape=out_shapes,
        grid_spec=pltpu.PrefetchScalarGridSpec(
            num_scalar_prefetch=0,
            grid=(S_pad // T,),
            in_specs=in_specs,
            out_specs=out_specs,
            scratch_shapes=[
                pltpu.VMEM((L, B_pad, H), f32),   # h state carry
                pltpu.VMEM((L, B_pad, H), f32),   # c state carry
            ],
        ),
        compiler_params=pltpu.CompilerParams(
            dimension_semantics=("arbitrary",)),  # recurrence over time
    )(*args)

    return out_p[:B, :C], (hn_p[:, :B, :], cn_p[:, :B, :])


# ---------------------------------------------------------------------------
# Deterministic parameter construction (PyTorch shapes / init convention)
# ---------------------------------------------------------------------------
def make_params(key, features, hidden_units, num_layers, num_classes):
    H = hidden_units
    k = 1.0 / jnp.sqrt(jnp.float32(H))
    lstm = []
    for l in range(num_layers):
        in_l = features if l == 0 else H
        key, k1, k2, k3, k4 = jax.random.split(key, 5)
        w_ih = jax.random.uniform(k1, (4 * H, in_l), jnp.float32, -k, k)
        w_hh = jax.random.uniform(k2, (4 * H, H), jnp.float32, -k, k)
        b_ih = jax.random.uniform(k3, (4 * H,), jnp.float32, -k, k)
        b_hh = jax.random.uniform(k4, (4 * H,), jnp.float32, -k, k)
        lstm.append((w_ih, w_hh, b_ih, b_hh))

    key, k1, k2, k3, k4 = jax.random.split(key, 5)
    kl = 1.0 / jnp.sqrt(jnp.float32(H))
    w1 = jax.random.uniform(k1, (128, H), jnp.float32, -kl, kl)
    b1 = jax.random.uniform(k2, (128,), jnp.float32, -kl, kl)
    kf = 1.0 / jnp.sqrt(jnp.float32(128))
    w2 = jax.random.uniform(k3, (num_classes, 128), jnp.float32, -kf, kf)
    b2 = jax.random.uniform(k4, (num_classes,), jnp.float32, -kf, kf)
    return {"lstm": lstm, "head": (w1, b1, w2, b2)}


# ---------------------------------------------------------------------------
# Pure-JAX reference (for correctness check)
# ---------------------------------------------------------------------------
def reference_forward(x, hidden, params, *, num_layers, hidden_units):
    H, L = hidden_units, num_layers
    h, c = hidden
    h = [h[l] for l in range(L)]
    c = [c[l] for l in range(L)]
    x_tm = jnp.transpose(x, (1, 0, 2))
    for t in range(x_tm.shape[0]):
        inp = x_tm[t]
        for l in range(L):
            w_ih, w_hh, b_ih, b_hh = params["lstm"][l]
            gates = inp @ w_ih.T + h[l] @ w_hh.T + b_ih + b_hh
            i_g = jax.nn.sigmoid(gates[:, 0:H])
            f_g = jax.nn.sigmoid(gates[:, H:2 * H])
            g_g = jnp.tanh(gates[:, 2 * H:3 * H])
            o_g = jax.nn.sigmoid(gates[:, 3 * H:4 * H])
            c[l] = f_g * c[l] + i_g * g_g
            h[l] = o_g * jnp.tanh(c[l])
            inp = h[l]
    w1, b1, w2, b2 = params["head"]
    out = jnp.maximum(inp @ w1.T + b1, 0.0) @ w2.T + b2
    return out, (jnp.stack(h), jnp.stack(c))


# ---------------------------------------------------------------------------
if __name__ == "__main__":
    B, S, F = 2, 8, 4          # batch, seq_len, features
    L, H, C = 2, 32, 5         # layers, hidden_units, number_of_classes

    key = jax.random.PRNGKey(0)
    key, kx = jax.random.split(key)
    x = jax.random.normal(kx, (B, S, F), jnp.float32)

    params = make_params(key, F, H, L, C)

    # init_hidden: ones (dtype downcast to float32 for TPU)
    h0 = jnp.ones((L, B, H), jnp.float32)
    c0 = jnp.ones((L, B, H), jnp.float32)

    out, (hn, cn) = valina_lstm_forward(
        x, (h0, c0), params,
        num_layers=L, hidden_units=H, num_classes=C)
    jax.block_until_ready((out, hn, cn))

    ref_out, (ref_hn, ref_cn) = reference_forward(
        x, (h0, c0), params, num_layers=L, hidden_units=H)

    assert out.shape == (B, C)
    assert hn.shape == (L, B, H) and cn.shape == (L, B, H)
    assert jnp.allclose(out, ref_out, rtol=1e-3, atol=1e-3)
    assert jnp.allclose(hn, ref_hn, rtol=1e-3, atol=1e-3)
    assert jnp.allclose(cn, ref_cn, rtol=1e-3, atol=1e-3)

    print("KERNEL_OK")
</pallas_src>

<mosaic_0001>
module attributes {stable_mosaic.version = 11 : i64} {
  func.func @kernel(%arg0: i32, %arg1: memref<8x8x128xf32, #tpu.memory_space<vmem>>, %arg2: memref<2x8x32xf32, #tpu.memory_space<vmem>>, %arg3: memref<2x8x32xf32, #tpu.memory_space<vmem>>, %arg4: memref<32x128xf32, #tpu.memory_space<vmem>>, %arg5: memref<32x128xf32, #tpu.memory_space<vmem>>, %arg6: memref<32x128xf32, #tpu.memory_space<vmem>>, %arg7: memref<8x128xf32, #tpu.memory_space<vmem>>, %arg8: memref<32x128xf32, #tpu.memory_space<vmem>>, %arg9: memref<1x128xf32, #tpu.memory_space<vmem>>, %arg10: memref<128x128xf32, #tpu.memory_space<vmem>>, %arg11: memref<1x128xf32, #tpu.memory_space<vmem>>, %arg12: memref<8x128xf32, #tpu.memory_space<vmem>>, %arg13: memref<2x8x32xf32, #tpu.memory_space<vmem>>, %arg14: memref<2x8x32xf32, #tpu.memory_space<vmem>>, %arg15: memref<2x8x32xf32, #tpu.memory_space<vmem>>, %arg16: memref<2x8x32xf32, #tpu.memory_space<vmem>>) attributes {dimension_semantics = [#tpu.dimension_semantics<arbitrary>], iteration_bounds = array<i64: 1>, scalar_prefetch = 0 : i64, scratch_operands = 2 : i64, tpu.core_type = #tpu.core_type<tc>, window_params = [{transform_indices = @transform_0, window_bounds = array<i64: 8, 8, 128>}, {pipeline_mode = #tpu.pipeline_mode<synchronous>, transform_indices = @transform_1, window_bounds = array<i64: 2, 8, 32>}, {pipeline_mode = #tpu.pipeline_mode<synchronous>, transform_indices = @transform_2, window_bounds = array<i64: 2, 8, 32>}, {pipeline_mode = #tpu.pipeline_mode<synchronous>, transform_indices = @transform_3, window_bounds = array<i64: 32, 128>}, {pipeline_mode = #tpu.pipeline_mode<synchronous>, transform_indices = @transform_4, window_bounds = array<i64: 32, 128>}, {pipeline_mode = #tpu.pipeline_mode<synchronous>, transform_indices = @transform_5, window_bounds = array<i64: 32, 128>}, {pipeline_mode = #tpu.pipeline_mode<synchronous>, transform_indices = @transform_6, window_bounds = array<i64: 8, 128>}, {pipeline_mode = #tpu.pipeline_mode<synchronous>, transform_indices = @transform_7, window_bounds = array<i64: 32, 128>}, {pipeline_mode = #tpu.pipeline_mode<synchronous>, transform_indices = @transform_8, window_bounds = array<i64: 1, 128>}, {pipeline_mode = #tpu.pipeline_mode<synchronous>, transform_indices = @transform_9, window_bounds = array<i64: 128, 128>}, {pipeline_mode = #tpu.pipeline_mode<synchronous>, transform_indices = @transform_10, window_bounds = array<i64: 1, 128>}, {pipeline_mode = #tpu.pipeline_mode<synchronous>, transform_indices = @transform_11, window_bounds = array<i64: 8, 128>}, {pipeline_mode = #tpu.pipeline_mode<synchronous>, transform_indices = @transform_12, window_bounds = array<i64: 2, 8, 32>}, {pipeline_mode = #tpu.pipeline_mode<synchronous>, transform_indices = @transform_13, window_bounds = array<i64: 2, 8, 32>}]} {
    %c0_i32 = arith.constant 0 : i32
    %0 = arith.cmpi eq, %arg0, %c0_i32 : i32
    %1 = arith.extui %0 : i1 to i32
    %c0_i32_0 = arith.constant 0 : i32
    %2 = arith.cmpi ne, %1, %c0_i32_0 : i32
    scf.if %2 {
      %c0_168 = arith.constant 0 : index
      %c0_169 = arith.constant 0 : index
      %c0_170 = arith.constant 0 : index
      %401 = vector.load %arg2[%c0_168, %c0_169, %c0_170] : memref<2x8x32xf32, #tpu.memory_space<vmem>>, vector<2x8x32xf32>
      %c0_171 = arith.constant 0 : index
      %c0_172 = arith.constant 0 : index
      %c0_173 = arith.constant 0 : index
      %402 = vector.load %arg15[%c0_171, %c0_172, %c0_173] : memref<2x8x32xf32, #tpu.memory_space<vmem>>, vector<2x8x32xf32>
      tpu.vector_store %arg15[%c0_171, %c0_172, %c0_173], %401 {strides = array<i32>} : memref<2x8x32xf32, #tpu.memory_space<vmem>>, vector<2x8x32xf32>,
      %c0_174 = arith.constant 0 : index
      %c0_175 = arith.constant 0 : index
      %c0_176 = arith.constant 0 : index
      %403 = vector.load %arg3[%c0_174, %c0_175, %c0_176] : memref<2x8x32xf32, #tpu.memory_space<vmem>>, vector<2x8x32xf32>
      %c0_177 = arith.constant 0 : index
      %c0_178 = arith.constant 0 : index
      %c0_179 = arith.constant 0 : index
      %404 = vector.load %arg16[%c0_177, %c0_178, %c0_179] : memref<2x8x32xf32, #tpu.memory_space<vmem>>, vector<2x8x32xf32>
      tpu.vector_store %arg16[%c0_177, %c0_178, %c0_179], %403 {strides = array<i32>} : memref<2x8x32xf32, #tpu.memory_space<vmem>>, vector<2x8x32xf32>,
    } else {
    }
    %c0 = arith.constant 0 : index
    %c0_1 = arith.constant 0 : index
    %c0_2 = arith.constant 0 : index
    %3 = vector.load %arg15[%c0, %c0_1, %c0_2] : memref<2x8x32xf32, #tpu.memory_space<vmem>>, vector<1x8x32xf32>
    %4 = vector.shape_cast %3 : vector<1x8x32xf32> to vector<8x32xf32>
    %c1 = arith.constant 1 : index
    %c0_3 = arith.constant 0 : index
    %c0_4 = arith.constant 0 : index
    %5 = vector.load %arg15[%c1, %c0_3, %c0_4] : memref<2x8x32xf32, #tpu.memory_space<vmem>>, vector<1x8x32xf32>
    %6 = vector.shape_cast %5 : vector<1x8x32xf32> to vector<8x32xf32>
    %c0_5 = arith.constant 0 : index
    %c0_6 = arith.constant 0 : index
    %c0_7 = arith.constant 0 : index
    %7 = vector.load %arg16[%c0_5, %c0_6, %c0_7] : memref<2x8x32xf32, #tpu.memory_space<vmem>>, vector<1x8x32xf32>
    %8 = vector.shape_cast %7 : vector<1x8x32xf32> to vector<8x32xf32>
    %c1_8 = arith.constant 1 : index
    %c0_9 = arith.constant 0 : index
    %c0_10 = arith.constant 0 : index
    %9 = vector.load %arg16[%c1_8, %c0_9, %c0_10] : memref<2x8x32xf32, #tpu.memory_space<vmem>>, vector<1x8x32xf32>
    %10 = vector.shape_cast %9 : vector<1x8x32xf32> to vector<8x32xf32>
    %c0_11 = arith.constant 0 : index
    %c0_12 = arith.constant 0 : index
    %c0_13 = arith.constant 0 : index
    %11 = vector.load %arg1[%c0_11, %c0_12, %c0_13] : memref<8x8x128xf32, #tpu.memory_space<vmem>>, vector<1x8x128xf32>
    %12 = vector.shape_cast %11 : vector<1x8x128xf32> to vector<8x128xf32>
    %c0_14 = arith.constant 0 : index
    %c0_15 = arith.constant 0 : index
    %13 = vector.load %arg4[%c0_14, %c0_15] : memref<32x128xf32, #tpu.memory_space<vmem>>, vector<32x128xf32>
    %cst = arith.constant dense<0.000000e+00> : vector<8x128xf32>
    %14 = tpu.matmul %4, %13, %cst {dimension_numbers = #tpu.dot_dimension_numbers<[1], [0], [0], [1], [0, 0, 1, 1], [], []>} : vector<8x32xf32>, vector<32x128xf32>, vector<8x128xf32> -> vector<8x128xf32>
    %15 = arith.addf %12, %14 : vector<8x128xf32>
    %16 = arith.negf %15 : vector<8x128xf32>
    %17 = math.exp %16 : vector<8x128xf32>
    %cst_16 = arith.constant 1.000000e+00 : f32
    %18 = vector.broadcast %cst_16 : f32 to vector<8x128xf32>
    %19 = arith.addf %18, %17 : vector<8x128xf32>
    %20 = arith.divf %18, %19 : vector<8x128xf32>
    %21 = vector.extract_strided_slice %20 {offsets = [0, 0], sizes = [8, 32], strides = [1, 1]} : vector<8x128xf32> to vector<8x32xf32>
    %22 = vector.extract_strided_slice %20 {offsets = [0, 32], sizes = [8, 32], strides = [1, 1]} : vector<8x128xf32> to vector<8x32xf32>
    %23 = vector.extract_strided_slice %20 {offsets = [0, 64], sizes = [8, 32], strides = [1, 1]} : vector<8x128xf32> to vector<8x32xf32>
    %cst_17 = arith.constant 2.000000e+00 : f32
    %24 = vector.broadcast %cst_17 : f32 to vector<8x32xf32>
    %25 = arith.mulf %24, %23 : vector<8x32xf32>
    %cst_18 = arith.constant 1.000000e+00 : f32
    %26 = vector.broadcast %cst_18 : f32 to vector<8x32xf32>
    %27 = arith.subf %25, %26 : vector<8x32xf32>
    %28 = vector.extract_strided_slice %20 {offsets = [0, 96], sizes = [8, 32], strides = [1, 1]} : vector<8x128xf32> to vector<8x32xf32>
    %29 = arith.mulf %22, %8 : vector<8x32xf32>
    %30 = arith.mulf %21, %27 : vector<8x32xf32>
    %31 = arith.addf %29, %30 : vector<8x32xf32>
    %32 = math.tanh %31 : vector<8x32xf32>
    %33 = arith.mulf %28, %32 : vector<8x32xf32>
    %c0_19 = arith.constant 0 : index
    %c0_20 = arith.constant 0 : index
    %34 = vector.load %arg5[%c0_19, %c0_20] : memref<32x128xf32, #tpu.memory_space<vmem>>, vector<32x128xf32>
    %cst_21 = arith.constant dense<0.000000e+00> : vector<8x128xf32>
    %35 = tpu.matmul %33, %34, %cst_21 {dimension_numbers = #tpu.dot_dimension_numbers<[1], [0], [0], [1], [0, 0, 1, 1], [], []>} : vector<8x32xf32>, vector<32x128xf32>, vector<8x128xf32> -> vector<8x128xf32>
    %c0_22 = arith.constant 0 : index
    %c0_23 = arith.constant 0 : index
    %36 = vector.load %arg6[%c0_22, %c0_23] : memref<32x128xf32, #tpu.memory_space<vmem>>, vector<32x128xf32>
    %cst_24 = arith.constant dense<0.000000e+00> : vector<8x128xf32>
    %37 = tpu.matmul %6, %36, %cst_24 {dimension_numbers = #tpu.dot_dimension_numbers<[1], [0], [0], [1], [0, 0, 1, 1], [], []>} : vector<8x32xf32>, vector<32x128xf32>, vector<8x128xf32> -> vector<8x128xf32>
    %38 = arith.addf %35, %37 : vector<8x128xf32>
    %c0_25 = arith.constant 0 : index
    %c0_26 = arith.constant 0 : index
    %39 = vector.load %arg7[%c0_25, %c0_26] : memref<8x128xf32, #tpu.memory_space<vmem>>, vector<8x128xf32>
    %40 = arith.addf %38, %39 : vector<8x128xf32>
    %41 = arith.negf %40 : vector<8x128xf32>
    %42 = math.exp %41 : vector<8x128xf32>
    %cst_27 = arith.constant 1.000000e+00 : f32
    %43 = vector.broadcast %cst_27 : f32 to vector<8x128xf32>
    %44 = arith.addf %43, %42 : vector<8x128xf32>
    %45 = arith.divf %43, %44 : vector<8x128xf32>
    %46 = vector.extract_strided_slice %45 {offsets = [0, 0], sizes = [8, 32], strides = [1, 1]} : vector<8x128xf32> to vector<8x32xf32>
    %47 = vector.extract_strided_slice %45 {offsets = [0, 32], sizes = [8, 32], strides = [1, 1]} : vector<8x128xf32> to vector<8x32xf32>
    %48 = vector.extract_strided_slice %45 {offsets = [0, 64], sizes = [8, 32], strides = [1, 1]} : vector<8x128xf32> to vector<8x32xf32>
    %cst_28 = arith.constant 2.000000e+00 : f32
    %49 = vector.broadcast %cst_28 : f32 to vector<8x32xf32>
    %50 = arith.mulf %49, %48 : vector<8x32xf32>
    %cst_29 = arith.constant 1.000000e+00 : f32
    %51 = vector.broadcast %cst_29 : f32 to vector<8x32xf32>
    %52 = arith.subf %50, %51 : vector<8x32xf32>
    %53 = vector.extract_strided_slice %45 {offsets = [0, 96], sizes = [8, 32], strides = [1, 1]} : vector<8x128xf32> to vector<8x32xf32>
    %54 = arith.mulf %47, %10 : vector<8x32xf32>
    %55 = arith.mulf %46, %52 : vector<8x32xf32>
    %56 = arith.addf %54, %55 : vector<8x32xf32>
    %57 = math.tanh %56 : vector<8x32xf32>
    %58 = arith.mulf %53, %57 : vector<8x32xf32>
    %c1_30 = arith.constant 1 : index
    %c0_31 = arith.constant 0 : index
    %c0_32 = arith.constant 0 : index
    %59 = vector.load %arg1[%c1_30, %c0_31, %c0_32] : memref<8x8x128xf32, #tpu.memory_space<vmem>>, vector<1x8x128xf32>
    %60 = vector.shape_cast %59 : vector<1x8x128xf32> to vector<8x128xf32>
    %c0_33 = arith.constant 0 : index
    %c0_34 = arith.constant 0 : index
    %61 = vector.load %arg4[%c0_33, %c0_34] : memref<32x128xf32, #tpu.memory_space<vmem>>, vector<32x128xf32>
    %cst_35 = arith.constant dense<0.000000e+00> : vector<8x128xf32>
    %62 = tpu.matmul %33, %61, %cst_35 {dimension_numbers = #tpu.dot_dimension_numbers<[1], [0], [0], [1], [0, 0, 1, 1], [], []>} : vector<8x32xf32>, vector<32x128xf32>, vector<8x128xf32> -> vector<8x128xf32>
    %63 = arith.addf %60, %62 : vector<8x128xf32>
    %64 = arith.negf %63 : vector<8x128xf32>
    %65 = math.exp %64 : vector<8x128xf32>
    %cst_36 = arith.constant 1.000000e+00 : f32
    %66 = vector.broadcast %cst_36 : f32 to vector<8x128xf32>
    %67 = arith.addf %66, %65 : vector<8x128xf32>
    %68 = arith.divf %66, %67 : vector<8x128xf32>
    %69 = vector.extract_strided_slice %68 {offsets = [0, 0], sizes = [8, 32], strides = [1, 1]} : vector<8x128xf32> to vector<8x32xf32>
    %70 = vector.extract_strided_slice %68 {offsets = [0, 32], sizes = [8, 32], strides = [1, 1]} : vector<8x128xf32> to vector<8x32xf32>
    %71 = vector.extract_strided_slice %68 {offsets = [0, 64], sizes = [8, 32], strides = [1, 1]} : vector<8x128xf32> to vector<8x32xf32>
    %cst_37 = arith.constant 2.000000e+00 : f32
    %72 = vector.broadcast %cst_37 : f32 to vector<8x32xf32>
    %73 = arith.mulf %72, %71 : vector<8x32xf32>
    %cst_38 = arith.constant 1.000000e+00 : f32
    %74 = vector.broadcast %cst_38 : f32 to vector<8x32xf32>
    %75 = arith.subf %73, %74 : vector<8x32xf32>
    %76 = vector.extract_strided_slice %68 {offsets = [0, 96], sizes = [8, 32], strides = [1, 1]} : vector<8x128xf32> to vector<8x32xf32>
    %77 = arith.mulf %70, %31 : vector<8x32xf32>
    %78 = arith.mulf %69, %75 : vector<8x32xf32>
    %79 = arith.addf %77, %78 : vector<8x32xf32>
    %80 = math.tanh %79 : vector<8x32xf32>
    %81 = arith.mulf %76, %80 : vector<8x32xf32>
    %c0_39 = arith.constant 0 : index
    %c0_40 = arith.constant 0 : index
    %82 = vector.load %arg5[%c0_39, %c0_40] : memref<32x128xf32, #tpu.memory_space<vmem>>, vector<32x128xf32>
    %cst_41 = arith.constant dense<0.000000e+00> : vector<8x128xf32>
    %83 = tpu.matmul %81, %82, %cst_41 {dimension_numbers = #tpu.dot_dimension_numbers<[1], [0], [0], [1], [0, 0, 1, 1], [], []>} : vector<8x32xf32>, vector<32x128xf32>, vector<8x128xf32> -> vector<8x128xf32>
    %c0_42 = arith.constant 0 : index
    %c0_43 = arith.constant 0 : index
    %84 = vector.load %arg6[%c0_42, %c0_43] : memref<32x128xf32, #tpu.memory_space<vmem>>, vector<32x128xf32>
    %cst_44 = arith.constant dense<0.000000e+00> : vector<8x128xf32>
    %85 = tpu.matmul %58, %84, %cst_44 {dimension_numbers = #tpu.dot_dimension_numbers<[1], [0], [0], [1], [0, 0, 1, 1], [], []>} : vector<8x32xf32>, vector<32x128xf32>, vector<8x128xf32> -> vector<8x128xf32>
    %86 = arith.addf %83, %85 : vector<8x128xf32>
    %c0_45 = arith.constant 0 : index
    %c0_46 = arith.constant 0 : index
    %87 = vector.load %arg7[%c0_45, %c0_46] : memref<8x128xf32, #tpu.memory_space<vmem>>, vector<8x128xf32>
    %88 = arith.addf %86, %87 : vector<8x128xf32>
    %89 = arith.negf %88 : vector<8x128xf32>
    %90 = math.exp %89 : vector<8x128xf32>
    %cst_47 = arith.constant 1.000000e+00 : f32
    %91 = vector.broadcast %cst_47 : f32 to vector<8x128xf32>
    %92 = arith.addf %91, %90 : vector<8x128xf32>
    %93 = arith.divf %91, %92 : vector<8x128xf32>
    %94 = vector.extract_strided_slice %93 {offsets = [0, 0], sizes = [8, 32], strides = [1, 1]} : vector<8x128xf32> to vector<8x32xf32>
    %95 = vector.extract_strided_slice %93 {offsets = [0, 32], sizes = [8, 32], strides = [1, 1]} : vector<8x128xf32> to vector<8x32xf32>
    %96 = vector.extract_strided_slice %93 {offsets = [0, 64], sizes = [8, 32], strides = [1, 1]} : vector<8x128xf32> to vector<8x32xf32>
    %cst_48 = arith.constant 2.000000e+00 : f32
    %97 = vector.broadcast %cst_48 : f32 to vector<8x32xf32>
    %98 = arith.mulf %97, %96 : vector<8x32xf32>
    %cst_49 = arith.constant 1.000000e+00 : f32
    %99 = vector.broadcast %cst_49 : f32 to vector<8x32xf32>
    %100 = arith.subf %98, %99 : vector<8x32xf32>
    %101 = vector.extract_strided_slice %93 {offsets = [0, 96], sizes = [8, 32], strides = [1, 1]} : vector<8x128xf32> to vector<8x32xf32>
    %102 = arith.mulf %95, %56 : vector<8x32xf32>
    %103 = arith.mulf %94, %100 : vector<8x32xf32>
    %104 = arith.addf %102, %103 : vector<8x32xf32>
    %105 = math.tanh %104 : vector<8x32xf32>
    %106 = arith.mulf %101, %105 : vector<8x32xf32>
    %c2 = arith.constant 2 : index
    %c0_50 = arith.constant 0 : index
    %c0_51 = arith.constant 0 : index
    %107 = vector.load %arg1[%c2, %c0_50, %c0_51] : memref<8x8x128xf32, #tpu.memory_space<vmem>>, vector<1x8x128xf32>
    %108 = vector.shape_cast %107 : vector<1x8x128xf32> to vector<8x128xf32>
    %c0_52 = arith.constant 0 : index
    %c0_53 = arith.constant 0 : index
    %109 = vector.load %arg4[%c0_52, %c0_53] : memref<32x128xf32, #tpu.memory_space<vmem>>, vector<32x128xf32>
    %cst_54 = arith.constant dense<0.000000e+00> : vector<8x128xf32>
    %110 = tpu.matmul %81, %109, %cst_54 {dimension_numbers = #tpu.dot_dimension_numbers<[1], [0], [0], [1], [0, 0, 1, 1], [], []>} : vector<8x32xf32>, vector<32x128xf32>, vector<8x128xf32> -> vector<8x128xf32>
    %111 = arith.addf %108, %110 : vector<8x128xf32>
    %112 = arith.negf %111 : vector<8x128xf32>
    %113 = math.exp %112 : vector<8x128xf32>
    %cst_55 = arith.constant 1.000000e+00 : f32
    %114 = vector.broadcast %cst_55 : f32 to vector<8x128xf32>
    %115 = arith.addf %114, %113 : vector<8x128xf32>
    %116 = arith.divf %114, %115 : vector<8x128xf32>
    %117 = vector.extract_strided_slice %116 {offsets = [0, 0], sizes = [8, 32], strides = [1, 1]} : vector<8x128xf32> to vector<8x32xf32>
    %118 = vector.extract_strided_slice %116 {offsets = [0, 32], sizes = [8, 32], strides = [1, 1]} : vector<8x128xf32> to vector<8x32xf32>
    %119 = vector.extract_strided_slice %116 {offsets = [0, 64], sizes = [8, 32], strides = [1, 1]} : vector<8x128xf32> to vector<8x32xf32>
    %cst_56 = arith.constant 2.000000e+00 : f32
    %120 = vector.broadcast %cst_56 : f32 to vector<8x32xf32>
    %121 = arith.mulf %120, %119 : vector<8x32xf32>
    %cst_57 = arith.constant 1.000000e+00 : f32
    %122 = vector.broadcast %cst_57 : f32 to vector<8x32xf32>
    %123 = arith.subf %121, %122 : vector<8x32xf32>
    %124 = vector.extract_strided_slice %116 {offsets = [0, 96], sizes = [8, 32], strides = [1, 1]} : vector<8x128xf32> to vector<8x32xf32>
    %125 = arith.mulf %118, %79 : vector<8x32xf32>
    %126 = arith.mulf %117, %123 : vector<8x32xf32>
    %127 = arith.addf %125, %126 : vector<8x32xf32>
    %128 = math.tanh %127 : vector<8x32xf32>
    %129 = arith.mulf %124, %128 : vector<8x32xf32>
    %c0_58 = arith.constant 0 : index
    %c0_59 = arith.constant 0 : index
    %130 = vector.load %arg5[%c0_58, %c0_59] : memref<32x128xf32, #tpu.memory_space<vmem>>, vector<32x128xf32>
    %cst_60 = arith.constant dense<0.000000e+00> : vector<8x128xf32>
    %131 = tpu.matmul %129, %130, %cst_60 {dimension_numbers = #tpu.dot_dimension_numbers<[1], [0], [0], [1], [0, 0, 1, 1], [], []>} : vector<8x32xf32>, vector<32x128xf32>, vector<8x128xf32> -> vector<8x128xf32>
    %c0_61 = arith.constant 0 : index
    %c0_62 = arith.constant 0 : index
    %132 = vector.load %arg6[%c0_61, %c0_62] : memref<32x128xf32, #tpu.memory_space<vmem>>, vector<32x128xf32>
    %cst_63 = arith.constant dense<0.000000e+00> : vector<8x128xf32>
    %133 = tpu.matmul %106, %132, %cst_63 {dimension_numbers = #tpu.dot_dimension_numbers<[1], [0], [0], [1], [0, 0, 1, 1], [], []>} : vector<8x32xf32>, vector<32x128xf32>, vector<8x128xf32> -> vector<8x128xf32>
    %134 = arith.addf %131, %133 : vector<8x128xf32>
    %c0_64 = arith.constant 0 : index
    %c0_65 = arith.constant 0 : index
    %135 = vector.load %arg7[%c0_64, %c0_65] : memref<8x128xf32, #tpu.memory_space<vmem>>, vector<8x128xf32>
    %136 = arith.addf %134, %135 : vector<8x128xf32>
    %137 = arith.negf %136 : vector<8x128xf32>
    %138 = math.exp %137 : vector<8x128xf32>
    %cst_66 = arith.constant 1.000000e+00 : f32
    %139 = vector.broadcast %cst_66 : f32 to vector<8x128xf32>
    %140 = arith.addf %139, %138 : vector<8x128xf32>
    %141 = arith.divf %139, %140 : vector<8x128xf32>
    %142 = vector.extract_strided_slice %141 {offsets = [0, 0], sizes = [8, 32], strides = [1, 1]} : vector<8x128xf32> to vector<8x32xf32>
    %143 = vector.extract_strided_slice %141 {offsets = [0, 32], sizes = [8, 32], strides = [1, 1]} : vector<8x128xf32> to vector<8x32xf32>
    %144 = vector.extract_strided_slice %141 {offsets = [0, 64], sizes = [8, 32], strides = [1, 1]} : vector<8x128xf32> to vector<8x32xf32>
    %cst_67 = arith.constant 2.000000e+00 : f32
    %145 = vector.broadcast %cst_67 : f32 to vector<8x32xf32>
    %146 = arith.mulf %145, %144 : vector<8x32xf32>
    %cst_68 = arith.constant 1.000000e+00 : f32
    %147 = vector.broadcast %cst_68 : f32 to vector<8x32xf32>
    %148 = arith.subf %146, %147 : vector<8x32xf32>
    %149 = vector.extract_strided_slice %141 {offsets = [0, 96], sizes = [8, 32], strides = [1, 1]} : vector<8x128xf32> to vector<8x32xf32>
    %150 = arith.mulf %143, %104 : vector<8x32xf32>
    %151 = arith.mulf %142, %148 : vector<8x32xf32>
    %152 = arith.addf %150, %151 : vector<8x32xf32>
    %153 = math.tanh %152 : vector<8x32xf32>
    %154 = arith.mulf %149, %153 : vector<8x32xf32>
    %c3 = arith.constant 3 : index
    %c0_69 = arith.constant 0 : index
    %c0_70 = arith.constant 0 : index
    %155 = vector.load %arg1[%c3, %c0_69, %c0_70] : memref<8x8x128xf32, #tpu.memory_space<vmem>>, vector<1x8x128xf32>
    %156 = vector.shape_cast %155 : vector<1x8x128xf32> to vector<8x128xf32>
    %c0_71 = arith.constant 0 : index
    %c0_72 = arith.constant 0 : index
    %157 = vector.load %arg4[%c0_71, %c0_72] : memref<32x128xf32, #tpu.memory_space<vmem>>, vector<32x128xf32>
    %cst_73 = arith.constant dense<0.000000e+00> : vector<8x128xf32>
    %158 = tpu.matmul %129, %157, %cst_73 {dimension_numbers = #tpu.dot_dimension_numbers<[1], [0], [0], [1], [0, 0, 1, 1], [], []>} : vector<8x32xf32>, vector<32x128xf32>, vector<8x128xf32> -> vector<8x128xf32>
    %159 = arith.addf %156, %158 : vector<8x128xf32>
    %160 = arith.negf %159 : vector<8x128xf32>
    %161 = math.exp %160 : vector<8x128xf32>
    %cst_74 = arith.constant 1.000000e+00 : f32
    %162 = vector.broadcast %cst_74 : f32 to vector<8x128xf32>
    %163 = arith.addf %162, %161 : vector<8x128xf32>
    %164 = arith.divf %162, %163 : vector<8x128xf32>
    %165 = vector.extract_strided_slice %164 {offsets = [0, 0], sizes = [8, 32], strides = [1, 1]} : vector<8x128xf32> to vector<8x32xf32>
    %166 = vector.extract_strided_slice %164 {offsets = [0, 32], sizes = [8, 32], strides = [1, 1]} : vector<8x128xf32> to vector<8x32xf32>
    %167 = vector.extract_strided_slice %164 {offsets = [0, 64], sizes = [8, 32], strides = [1, 1]} : vector<8x128xf32> to vector<8x32xf32>
    %cst_75 = arith.constant 2.000000e+00 : f32
    %168 = vector.broadcast %cst_75 : f32 to vector<8x32xf32>
    %169 = arith.mulf %168, %167 : vector<8x32xf32>
    %cst_76 = arith.constant 1.000000e+00 : f32
    %170 = vector.broadcast %cst_76 : f32 to vector<8x32xf32>
    %171 = arith.subf %169, %170 : vector<8x32xf32>
    %172 = vector.extract_strided_slice %164 {offsets = [0, 96], sizes = [8, 32], strides = [1, 1]} : vector<8x128xf32> to vector<8x32xf32>
    %173 = arith.mulf %166, %127 : vector<8x32xf32>
    %174 = arith.mulf %165, %171 : vector<8x32xf32>
    %175 = arith.addf %173, %174 : vector<8x32xf32>
    %176 = math.tanh %175 : vector<8x32xf32>
    %177 = arith.mulf %172, %176 : vector<8x32xf32>
    %c0_77 = arith.constant 0 : index
    %c0_78 = arith.constant 0 : index
    %178 = vector.load %arg5[%c0_77, %c0_78] : memref<32x128xf32, #tpu.memory_space<vmem>>, vector<32x128xf32>
    %cst_79 = arith.constant dense<0.000000e+00> : vector<8x128xf32>
    %179 = tpu.matmul %177, %178, %cst_79 {dimension_numbers = #tpu.dot_dimension_numbers<[1], [0], [0], [1], [0, 0, 1, 1], [], []>} : vector<8x32xf32>, vector<32x128xf32>, vector<8x128xf32> -> vector<8x128xf32>
    %c0_80 = arith.constant 0 : index
    %c0_81 = arith.constant 0 : index
    %180 = vector.load %arg6[%c0_80, %c0_81] : memref<32x128xf32, #tpu.memory_space<vmem>>, vector<32x128xf32>
    %cst_82 = arith.constant dense<0.000000e+00> : vector<8x128xf32>
    %181 = tpu.matmul %154, %180, %cst_82 {dimension_numbers = #tpu.dot_dimension_numbers<[1], [0], [0], [1], [0, 0, 1, 1], [], []>} : vector<8x32xf32>, vector<32x128xf32>, vector<8x128xf32> -> vector<8x128xf32>
    %182 = arith.addf %179, %181 : vector<8x128xf32>
    %c0_83 = arith.constant 0 : index
    %c0_84 = arith.constant 0 : index
    %183 = vector.load %arg7[%c0_83, %c0_84] : memref<8x128xf32, #tpu.memory_space<vmem>>, vector<8x128xf32>
    %184 = arith.addf %182, %183 : vector<8x128xf32>
    %185 = arith.negf %184 : vector<8x128xf32>
    %186 = math.exp %185 : vector<8x128xf32>
    %cst_85 = arith.constant 1.000000e+00 : f32
    %187 = vector.broadcast %cst_85 : f32 to vector<8x128xf32>
    %188 = arith.addf %187, %186 : vector<8x128xf32>
    %189 = arith.divf %187, %188 : vector<8x128xf32>
    %190 = vector.extract_strided_slice %189 {offsets = [0, 0], sizes = [8, 32], strides = [1, 1]} : vector<8x128xf32> to vector<8x32xf32>
    %191 = vector.extract_strided_slice %189 {offsets = [0, 32], sizes = [8, 32], strides = [1, 1]} : vector<8x128xf32> to vector<8x32xf32>
    %192 = vector.extract_strided_slice %189 {offsets = [0, 64], sizes = [8, 32], strides = [1, 1]} : vector<8x128xf32> to vector<8x32xf32>
    %cst_86 = arith.constant 2.000000e+00 : f32
    %193 = vector.broadcast %cst_86 : f32 to vector<8x32xf32>
    %194 = arith.mulf %193, %192 : vector<8x32xf32>
    %cst_87 = arith.constant 1.000000e+00 : f32
    %195 = vector.broadcast %cst_87 : f32 to vector<8x32xf32>
    %196 = arith.subf %194, %195 : vector<8x32xf32>
    %197 = vector.extract_strided_slice %189 {offsets = [0, 96], sizes = [8, 32], strides = [1, 1]} : vector<8x128xf32> to vector<8x32xf32>
    %198 = arith.mulf %191, %152 : vector<8x32xf32>
    %199 = arith.mulf %190, %196 : vector<8x32xf32>
    %200 = arith.addf %198, %199 : vector<8x32xf32>
    %201 = math.tanh %200 : vector<8x32xf32>
    %202 = arith.mulf %197, %201 : vector<8x32xf32>
    %c4 = arith.constant 4 : index
    %c0_88 = arith.constant 0 : index
    %c0_89 = arith.constant 0 : index
    %203 = vector.load %arg1[%c4, %c0_88, %c0_89] : memref<8x8x128xf32, #tpu.memory_space<vmem>>, vector<1x8x128xf32>
    %204 = vector.shape_cast %203 : vector<1x8x128xf32> to vector<8x128xf32>
    %c0_90 = arith.constant 0 : index
    %c0_91 = arith.constant 0 : index
    %205 = vector.load %arg4[%c0_90, %c0_91] : memref<32x128xf32, #tpu.memory_space<vmem>>, vector<32x128xf32>
    %cst_92 = arith.constant dense<0.000000e+00> : vector<8x128xf32>
    %206 = tpu.matmul %177, %205, %cst_92 {dimension_numbers = #tpu.dot_dimension_numbers<[1], [0], [0], [1], [0, 0, 1, 1], [], []>} : vector<8x32xf32>, vector<32x128xf32>, vector<8x128xf32> -> vector<8x128xf32>
    %207 = arith.addf %204, %206 : vector<8x128xf32>
    %208 = arith.negf %207 : vector<8x128xf32>
    %209 = math.exp %208 : vector<8x128xf32>
    %cst_93 = arith.constant 1.000000e+00 : f32
    %210 = vector.broadcast %cst_93 : f32 to vector<8x128xf32>
    %211 = arith.addf %210, %209 : vector<8x128xf32>
    %212 = arith.divf %210, %211 : vector<8x128xf32>
    %213 = vector.extract_strided_slice %212 {offsets = [0, 0], sizes = [8, 32], strides = [1, 1]} : vector<8x128xf32> to vector<8x32xf32>
    %214 = vector.extract_strided_slice %212 {offsets = [0, 32], sizes = [8, 32], strides = [1, 1]} : vector<8x128xf32> to vector<8x32xf32>
    %215 = vector.extract_strided_slice %212 {offsets = [0, 64], sizes = [8, 32], strides = [1, 1]} : vector<8x128xf32> to vector<8x32xf32>
    %cst_94 = arith.constant 2.000000e+00 : f32
    %216 = vector.broadcast %cst_94 : f32 to vector<8x32xf32>
    %217 = arith.mulf %216, %215 : vector<8x32xf32>
    %cst_95 = arith.constant 1.000000e+00 : f32
    %218 = vector.broadcast %cst_95 : f32 to vector<8x32xf32>
    %219 = arith.subf %217, %218 : vector<8x32xf32>
    %220 = vector.extract_strided_slice %212 {offsets = [0, 96], sizes = [8, 32], strides = [1, 1]} : vector<8x128xf32> to vector<8x32xf32>
    %221 = arith.mulf %214, %175 : vector<8x32xf32>
    %222 = arith.mulf %213, %219 : vector<8x32xf32>
    %223 = arith.addf %221, %222 : vector<8x32xf32>
    %224 = math.tanh %223 : vector<8x32xf32>
    %225 = arith.mulf %220, %224 : vector<8x32xf32>
    %c0_96 = arith.constant 0 : index
    %c0_97 = arith.constant 0 : index
    %226 = vector.load %arg5[%c0_96, %c0_97] : memref<32x128xf32, #tpu.memory_space<vmem>>, vector<32x128xf32>
    %cst_98 = arith.constant dense<0.000000e+00> : vector<8x128xf32>
    %227 = tpu.matmul %225, %226, %cst_98 {dimension_numbers = #tpu.dot_dimension_numbers<[1], [0], [0], [1], [0, 0, 1, 1], [], []>} : vector<8x32xf32>, vector<32x128xf32>, vector<8x128xf32> -> vector<8x128xf32>
    %c0_99 = arith.constant 0 : index
    %c0_100 = arith.constant 0 : index
    %228 = vector.load %arg6[%c0_99, %c0_100] : memref<32x128xf32, #tpu.memory_space<vmem>>, vector<32x128xf32>
    %cst_101 = arith.constant dense<0.000000e+00> : vector<8x128xf32>
    %229 = tpu.matmul %202, %228, %cst_101 {dimension_numbers = #tpu.dot_dimension_numbers<[1], [0], [0], [1], [0, 0, 1, 1], [], []>} : vector<8x32xf32>, vector<32x128xf32>, vector<8x128xf32> -> vector<8x128xf32>
    %230 = arith.addf %227, %229 : vector<8x128xf32>
    %c0_102 = arith.constant 0 : index
    %c0_103 = arith.constant 0 : index
    %231 = vector.load %arg7[%c0_102, %c0_103] : memref<8x128xf32, #tpu.memory_space<vmem>>, vector<8x128xf32>
    %232 = arith.addf %230, %231 : vector<8x128xf32>
    %233 = arith.negf %232 : vector<8x128xf32>
    %234 = math.exp %233 : vector<8x128xf32>
    %cst_104 = arith.constant 1.000000e+00 : f32
    %235 = vector.broadcast %cst_104 : f32 to vector<8x128xf32>
    %236 = arith.addf %235, %234 : vector<8x128xf32>
    %237 = arith.divf %235, %236 : vector<8x128xf32>
    %238 = vector.extract_strided_slice %237 {offsets = [0, 0], sizes = [8, 32], strides = [1, 1]} : vector<8x128xf32> to vector<8x32xf32>
    %239 = vector.extract_strided_slice %237 {offsets = [0, 32], sizes = [8, 32], strides = [1, 1]} : vector<8x128xf32> to vector<8x32xf32>
    %240 = vector.extract_strided_slice %237 {offsets = [0, 64], sizes = [8, 32], strides = [1, 1]} : vector<8x128xf32> to vector<8x32xf32>
    %cst_105 = arith.constant 2.000000e+00 : f32
    %241 = vector.broadcast %cst_105 : f32 to vector<8x32xf32>
    %242 = arith.mulf %241, %240 : vector<8x32xf32>
    %cst_106 = arith.constant 1.000000e+00 : f32
    %243 = vector.broadcast %cst_106 : f32 to vector<8x32xf32>
    %244 = arith.subf %242, %243 : vector<8x32xf32>
    %245 = vector.extract_strided_slice %237 {offsets = [0, 96], sizes = [8, 32], strides = [1, 1]} : vector<8x128xf32> to vector<8x32xf32>
    %246 = arith.mulf %239, %200 : vector<8x32xf32>
    %247 = arith.mulf %238, %244 : vector<8x32xf32>
    %248 = arith.addf %246, %247 : vector<8x32xf32>
    %249 = math.tanh %248 : vector<8x32xf32>
    %250 = arith.mulf %245, %249 : vector<8x32xf32>
    %c5 = arith.constant 5 : index
    %c0_107 = arith.constant 0 : index
    %c0_108 = arith.constant 0 : index
    %251 = vector.load %arg1[%c5, %c0_107, %c0_108] : memref<8x8x128xf32, #tpu.memory_space<vmem>>, vector<1x8x128xf32>
    %252 = vector.shape_cast %251 : vector<1x8x128xf32> to vector<8x128xf32>
    %c0_109 = arith.constant 0 : index
    %c0_110 = arith.constant 0 : index
    %253 = vector.load %arg4[%c0_109, %c0_110] : memref<32x128xf32, #tpu.memory_space<vmem>>, vector<32x128xf32>
    %cst_111 = arith.constant dense<0.000000e+00> : vector<8x128xf32>
    %254 = tpu.matmul %225, %253, %cst_111 {dimension_numbers = #tpu.dot_dimension_numbers<[1], [0], [0], [1], [0, 0, 1, 1], [], []>} : vector<8x32xf32>, vector<32x128xf32>, vector<8x128xf32> -> vector<8x128xf32>
    %255 = arith.addf %252, %254 : vector<8x128xf32>
    %256 = arith.negf %255 : vector<8x128xf32>
    %257 = math.exp %256 : vector<8x128xf32>
    %cst_112 = arith.constant 1.000000e+00 : f32
    %258 = vector.broadcast %cst_112 : f32 to vector<8x128xf32>
    %259 = arith.addf %258, %257 : vector<8x128xf32>
    %260 = arith.divf %258, %259 : vector<8x128xf32>
    %261 = vector.extract_strided_slice %260 {offsets = [0, 0], sizes = [8, 32], strides = [1, 1]} : vector<8x128xf32> to vector<8x32xf32>
    %262 = vector.extract_strided_slice %260 {offsets = [0, 32], sizes = [8, 32], strides = [1, 1]} : vector<8x128xf32> to vector<8x32xf32>
    %263 = vector.extract_strided_slice %260 {offsets = [0, 64], sizes = [8, 32], strides = [1, 1]} : vector<8x128xf32> to vector<8x32xf32>
    %cst_113 = arith.constant 2.000000e+00 : f32
    %264 = vector.broadcast %cst_113 : f32 to vector<8x32xf32>
    %265 = arith.mulf %264, %263 : vector<8x32xf32>
    %cst_114 = arith.constant 1.000000e+00 : f32
    %266 = vector.broadcast %cst_114 : f32 to vector<8x32xf32>
    %267 = arith.subf %265, %266 : vector<8x32xf32>
    %268 = vector.extract_strided_slice %260 {offsets = [0, 96], sizes = [8, 32], strides = [1, 1]} : vector<8x128xf32> to vector<8x32xf32>
    %269 = arith.mulf %262, %223 : vector<8x32xf32>
    %270 = arith.mulf %261, %267 : vector<8x32xf32>
    %271 = arith.addf %269, %270 : vector<8x32xf32>
    %272 = math.tanh %271 : vector<8x32xf32>
    %273 = arith.mulf %268, %272 : vector<8x32xf32>
    %c0_115 = arith.constant 0 : index
    %c0_116 = arith.constant 0 : index
    %274 = vector.load %arg5[%c0_115, %c0_116] : memref<32x128xf32, #tpu.memory_space<vmem>>, vector<32x128xf32>
    %cst_117 = arith.constant dense<0.000000e+00> : vector<8x128xf32>
    %275 = tpu.matmul %273, %274, %cst_117 {dimension_numbers = #tpu.dot_dimension_numbers<[1], [0], [0], [1], [0, 0, 1, 1], [], []>} : vector<8x32xf32>, vector<32x128xf32>, vector<8x128xf32> -> vector<8x128xf32>
    %c0_118 = arith.constant 0 : index
    %c0_119 = arith.constant 0 : index
    %276 = vector.load %arg6[%c0_118, %c0_119] : memref<32x128xf32, #tpu.memory_space<vmem>>, vector<32x128xf32>
    %cst_120 = arith.constant dense<0.000000e+00> : vector<8x128xf32>
    %277 = tpu.matmul %250, %276, %cst_120 {dimension_numbers = #tpu.dot_dimension_numbers<[1], [0], [0], [1], [0, 0, 1, 1], [], []>} : vector<8x32xf32>, vector<32x128xf32>, vector<8x128xf32> -> vector<8x128xf32>
    %278 = arith.addf %275, %277 : vector<8x128xf32>
    %c0_121 = arith.constant 0 : index
    %c0_122 = arith.constant 0 : index
    %279 = vector.load %arg7[%c0_121, %c0_122] : memref<8x128xf32, #tpu.memory_space<vmem>>, vector<8x128xf32>
    %280 = arith.addf %278, %279 : vector<8x128xf32>
    %281 = arith.negf %280 : vector<8x128xf32>
    %282 = math.exp %281 : vector<8x128xf32>
    %cst_123 = arith.constant 1.000000e+00 : f32
    %283 = vector.broadcast %cst_123 : f32 to vector<8x128xf32>
    %284 = arith.addf %283, %282 : vector<8x128xf32>
    %285 = arith.divf %283, %284 : vector<8x128xf32>
    %286 = vector.extract_strided_slice %285 {offsets = [0, 0], sizes = [8, 32], strides = [1, 1]} : vector<8x128xf32> to vector<8x32xf32>
    %287 = vector.extract_strided_slice %285 {offsets = [0, 32], sizes = [8, 32], strides = [1, 1]} : vector<8x128xf32> to vector<8x32xf32>
    %288 = vector.extract_strided_slice %285 {offsets = [0, 64], sizes = [8, 32], strides = [1, 1]} : vector<8x128xf32> to vector<8x32xf32>
    %cst_124 = arith.constant 2.000000e+00 : f32
    %289 = vector.broadcast %cst_124 : f32 to vector<8x32xf32>
    %290 = arith.mulf %289, %288 : vector<8x32xf32>
    %cst_125 = arith.constant 1.000000e+00 : f32
    %291 = vector.broadcast %cst_125 : f32 to vector<8x32xf32>
    %292 = arith.subf %290, %291 : vector<8x32xf32>
    %293 = vector.extract_strided_slice %285 {offsets = [0, 96], sizes = [8, 32], strides = [1, 1]} : vector<8x128xf32> to vector<8x32xf32>
    %294 = arith.mulf %287, %248 : vector<8x32xf32>
    %295 = arith.mulf %286, %292 : vector<8x32xf32>
    %296 = arith.addf %294, %295 : vector<8x32xf32>
    %297 = math.tanh %296 : vector<8x32xf32>
    %298 = arith.mulf %293, %297 : vector<8x32xf32>
    %c6 = arith.constant 6 : index
    %c0_126 = arith.constant 0 : index
    %c0_127 = arith.constant 0 : index
    %299 = vector.load %arg1[%c6, %c0_126, %c0_127] : memref<8x8x128xf32, #tpu.memory_space<vmem>>, vector<1x8x128xf32>
    %300 = vector.shape_cast %299 : vector<1x8x128xf32> to vector<8x128xf32>
    %c0_128 = arith.constant 0 : index
    %c0_129 = arith.constant 0 : index
    %301 = vector.load %arg4[%c0_128, %c0_129] : memref<32x128xf32, #tpu.memory_space<vmem>>, vector<32x128xf32>
    %cst_130 = arith.constant dense<0.000000e+00> : vector<8x128xf32>
    %302 = tpu.matmul %273, %301, %cst_130 {dimension_numbers = #tpu.dot_dimension_numbers<[1], [0], [0], [1], [0, 0, 1, 1], [], []>} : vector<8x32xf32>, vector<32x128xf32>, vector<8x128xf32> -> vector<8x128xf32>
    %303 = arith.addf %300, %302 : vector<8x128xf32>
    %304 = arith.negf %303 : vector<8x128xf32>
    %305 = math.exp %304 : vector<8x128xf32>
    %cst_131 = arith.constant 1.000000e+00 : f32
    %306 = vector.broadcast %cst_131 : f32 to vector<8x128xf32>
    %307 = arith.addf %306, %305 : vector<8x128xf32>
    %308 = arith.divf %306, %307 : vector<8x128xf32>
    %309 = vector.extract_strided_slice %308 {offsets = [0, 0], sizes = [8, 32], strides = [1, 1]} : vector<8x128xf32> to vector<8x32xf32>
    %310 = vector.extract_strided_slice %308 {offsets = [0, 32], sizes = [8, 32], strides = [1, 1]} : vector<8x128xf32> to vector<8x32xf32>
    %311 = vector.extract_strided_slice %308 {offsets = [0, 64], sizes = [8, 32], strides = [1, 1]} : vector<8x128xf32> to vector<8x32xf32>
    %cst_132 = arith.constant 2.000000e+00 : f32
    %312 = vector.broadcast %cst_132 : f32 to vector<8x32xf32>
    %313 = arith.mulf %312, %311 : vector<8x32xf32>
    %cst_133 = arith.constant 1.000000e+00 : f32
    %314 = vector.broadcast %cst_133 : f32 to vector<8x32xf32>
    %315 = arith.subf %313, %314 : vector<8x32xf32>
    %316 = vector.extract_strided_slice %308 {offsets = [0, 96], sizes = [8, 32], strides = [1, 1]} : vector<8x128xf32> to vector<8x32xf32>
    %317 = arith.mulf %310, %271 : vector<8x32xf32>
    %318 = arith.mulf %309, %315 : vector<8x32xf32>
    %319 = arith.addf %317, %318 : vector<8x32xf32>
    %320 = math.tanh %319 : vector<8x32xf32>
    %321 = arith.mulf %316, %320 : vector<8x32xf32>
    %c0_134 = arith.constant 0 : index
    %c0_135 = arith.constant 0 : index
    %322 = vector.load %arg5[%c0_134, %c0_135] : memref<32x128xf32, #tpu.memory_space<vmem>>, vector<32x128xf32>
    %cst_136 = arith.constant dense<0.000000e+00> : vector<8x128xf32>
    %323 = tpu.matmul %321, %322, %cst_136 {dimension_numbers = #tpu.dot_dimension_numbers<[1], [0], [0], [1], [0, 0, 1, 1], [], []>} : vector<8x32xf32>, vector<32x128xf32>, vector<8x128xf32> -> vector<8x128xf32>
    %c0_137 = arith.constant 0 : index
    %c0_138 = arith.constant 0 : index
    %324 = vector.load %arg6[%c0_137, %c0_138] : memref<32x128xf32, #tpu.memory_space<vmem>>, vector<32x128xf32>
    %cst_139 = arith.constant dense<0.000000e+00> : vector<8x128xf32>
    %325 = tpu.matmul %298, %324, %cst_139 {dimension_numbers = #tpu.dot_dimension_numbers<[1], [0], [0], [1], [0, 0, 1, 1], [], []>} : vector<8x32xf32>, vector<32x128xf32>, vector<8x128xf32> -> vector<8x128xf32>
    %326 = arith.addf %323, %325 : vector<8x128xf32>
    %c0_140 = arith.constant 0 : index
    %c0_141 = arith.constant 0 : index
    %327 = vector.load %arg7[%c0_140, %c0_141] : memref<8x128xf32, #tpu.memory_space<vmem>>, vector<8x128xf32>
    %328 = arith.addf %326, %327 : vector<8x128xf32>
    %329 = arith.negf %328 : vector<8x128xf32>
    %330 = math.exp %329 : vector<8x128xf32>
    %cst_142 = arith.constant 1.000000e+00 : f32
    %331 = vector.broadcast %cst_142 : f32 to vector<8x128xf32>
    %332 = arith.addf %331, %330 : vector<8x128xf32>
    %333 = arith.divf %331, %332 : vector<8x128xf32>
    %334 = vector.extract_strided_slice %333 {offsets = [0, 0], sizes = [8, 32], strides = [1, 1]} : vector<8x128xf32> to vector<8x32xf32>
    %335 = vector.extract_strided_slice %333 {offsets = [0, 32], sizes = [8, 32], strides = [1, 1]} : vector<8x128xf32> to vector<8x32xf32>
    %336 = vector.extract_strided_slice %333 {offsets = [0, 64], sizes = [8, 32], strides = [1, 1]} : vector<8x128xf32> to vector<8x32xf32>
    %cst_143 = arith.constant 2.000000e+00 : f32
    %337 = vector.broadcast %cst_143 : f32 to vector<8x32xf32>
    %338 = arith.mulf %337, %336 : vector<8x32xf32>
    %cst_144 = arith.constant 1.000000e+00 : f32
    %339 = vector.broadcast %cst_144 : f32 to vector<8x32xf32>
    %340 = arith.subf %338, %339 : vector<8x32xf32>
    %341 = vector.extract_strided_slice %333 {offsets = [0, 96], sizes = [8, 32], strides = [1, 1]} : vector<8x128xf32> to vector<8x32xf32>
    %342 = arith.mulf %335, %296 : vector<8x32xf32>
    %343 = arith.mulf %334, %340 : vector<8x32xf32>
    %344 = arith.addf %342, %343 : vector<8x32xf32>
    %345 = math.tanh %344 : vector<8x32xf32>
    %346 = arith.mulf %341, %345 : vector<8x32xf32>
    %c7 = arith.constant 7 : index
    %c0_145 = arith.constant 0 : index
    %c0_146 = arith.constant 0 : index
    %347 = vector.load %arg1[%c7, %c0_145, %c0_146] : memref<8x8x128xf32, #tpu.memory_space<vmem>>, vector<1x8x128xf32>
    %348 = vector.shape_cast %347 : vector<1x8x128xf32> to vector<8x128xf32>
    %c0_147 = arith.constant 0 : index
    %c0_148 = arith.constant 0 : index
    %349 = vector.load %arg4[%c0_147, %c0_148] : memref<32x128xf32, #tpu.memory_space<vmem>>, vector<32x128xf32>
    %cst_149 = arith.constant dense<0.000000e+00> : vector<8x128xf32>
    %350 = tpu.matmul %321, %349, %cst_149 {dimension_numbers = #tpu.dot_dimension_numbers<[1], [0], [0], [1], [0, 0, 1, 1], [], []>} : vector<8x32xf32>, vector<32x128xf32>, vector<8x128xf32> -> vector<8x128xf32>
    %351 = arith.addf %348, %350 : vector<8x128xf32>
    %352 = arith.negf %351 : vector<8x128xf32>
    %353 = math.exp %352 : vector<8x128xf32>
    %cst_150 = arith.constant 1.000000e+00 : f32
    %354 = vector.broadcast %cst_150 : f32 to vector<8x128xf32>
    %355 = arith.addf %354, %353 : vector<8x128xf32>
    %356 = arith.divf %354, %355 : vector<8x128xf32>
    %357 = vector.extract_strided_slice %356 {offsets = [0, 0], sizes = [8, 32], strides = [1, 1]} : vector<8x128xf32> to vector<8x32xf32>
    %358 = vector.extract_strided_slice %356 {offsets = [0, 32], sizes = [8, 32], strides = [1, 1]} : vector<8x128xf32> to vector<8x32xf32>
    %359 = vector.extract_strided_slice %356 {offsets = [0, 64], sizes = [8, 32], strides = [1, 1]} : vector<8x128xf32> to vector<8x32xf32>
    %cst_151 = arith.constant 2.000000e+00 : f32
    %360 = vector.broadcast %cst_151 : f32 to vector<8x32xf32>
    %361 = arith.mulf %360, %359 : vector<8x32xf32>
    %cst_152 = arith.constant 1.000000e+00 : f32
    %362 = vector.broadcast %cst_152 : f32 to vector<8x32xf32>
    %363 = arith.subf %361, %362 : vector<8x32xf32>
    %364 = vector.extract_strided_slice %356 {offsets = [0, 96], sizes = [8, 32], strides = [1, 1]} : vector<8x128xf32> to vector<8x32xf32>
    %365 = arith.mulf %358, %319 : vector<8x32xf32>
    %366 = arith.mulf %357, %363 : vector<8x32xf32>
    %367 = arith.addf %365, %366 : vector<8x32xf32>
    %368 = math.tanh %367 : vector<8x32xf32>
    %369 = arith.mulf %364, %368 : vector<8x32xf32>
    %c0_153 = arith.constant 0 : index
    %c0_154 = arith.constant 0 : index
    %370 = vector.load %arg5[%c0_153, %c0_154] : memref<32x128xf32, #tpu.memory_space<vmem>>, vector<32x128xf32>
    %cst_155 = arith.constant dense<0.000000e+00> : vector<8x128xf32>
    %371 = tpu.matmul %369, %370, %cst_155 {dimension_numbers = #tpu.dot_dimension_numbers<[1], [0], [0], [1], [0, 0, 1, 1], [], []>} : vector<8x32xf32>, vector<32x128xf32>, vector<8x128xf32> -> vector<8x128xf32>
    %c0_156 = arith.constant 0 : index
    %c0_157 = arith.constant 0 : index
    %372 = vector.load %arg6[%c0_156, %c0_157] : memref<32x128xf32, #tpu.memory_space<vmem>>, vector<32x128xf32>
    %cst_158 = arith.constant dense<0.000000e+00> : vector<8x128xf32>
    %373 = tpu.matmul %346, %372, %cst_158 {dimension_numbers = #tpu.dot_dimension_numbers<[1], [0], [0], [1], [0, 0, 1, 1], [], []>} : vector<8x32xf32>, vector<32x128xf32>, vector<8x128xf32> -> vector<8x128xf32>
    %374 = arith.addf %371, %373 : vector<8x128xf32>
    %c0_159 = arith.constant 0 : index
    %c0_160 = arith.constant 0 : index
    %375 = vector.load %arg7[%c0_159, %c0_160] : memref<8x128xf32, #tpu.memory_space<vmem>>, vector<8x128xf32>
    %376 = arith.addf %374, %375 : vector<8x128xf32>
    %377 = arith.negf %376 : vector<8x128xf32>
    %378 = math.exp %377 : vector<8x128xf32>
    %cst_161 = arith.constant 1.000000e+00 : f32
    %379 = vector.broadcast %cst_161 : f32 to vector<8x128xf32>
    %380 = arith.addf %379, %378 : vector<8x128xf32>
    %381 = arith.divf %379, %380 : vector<8x128xf32>
    %382 = vector.extract_strided_slice %381 {offsets = [0, 0], sizes = [8, 32], strides = [1, 1]} : vector<8x128xf32> to vector<8x32xf32>
    %383 = vector.extract_strided_slice %381 {offsets = [0, 32], sizes = [8, 32], strides = [1, 1]} : vector<8x128xf32> to vector<8x32xf32>
    %384 = vector.extract_strided_slice %381 {offsets = [0, 64], sizes = [8, 32], strides = [1, 1]} : vector<8x128xf32> to vector<8x32xf32>
    %cst_162 = arith.constant 2.000000e+00 : f32
    %385 = vector.broadcast %cst_162 : f32 to vector<8x32xf32>
    %386 = arith.mulf %385, %384 : vector<8x32xf32>
    %cst_163 = arith.constant 1.000000e+00 : f32
    %387 = vector.broadcast %cst_163 : f32 to vector<8x32xf32>
    %388 = arith.subf %386, %387 : vector<8x32xf32>
    %389 = vector.extract_strided_slice %381 {offsets = [0, 96], sizes = [8, 32], strides = [1, 1]} : vector<8x128xf32> to vector<8x32xf32>
    %390 = arith.mulf %383, %344 : vector<8x32xf32>
    %391 = arith.mulf %382, %388 : vector<8x32xf32>
    %392 = arith.addf %390, %391 : vector<8x32xf32>
    %393 = math.tanh %392 : vector<8x32xf32>
    %394 = arith.mulf %389, %393 : vector<8x32xf32>
    %c0_i32_164 = arith.constant 0 : i32
    %395 = arith.cmpi slt, %arg0, %c0_i32_164 : i32
    %396 = arith.extui %395 : i1 to i32
    %c0_i32_165 = arith.constant 0 : i32
    %397 = arith.cmpi ne, %396, %c0_i32_165 : i32
    scf.if %397 {
      %c0_168 = arith.constant 0 : index
      %c0_169 = arith.constant 0 : index
      %c0_170 = arith.constant 0 : index
      %401 = vector.load %arg15[%c0_168, %c0_169, %c0_170] : memref<2x8x32xf32, #tpu.memory_space<vmem>>, vector<1x8x32xf32>
      %402 = vector.shape_cast %401 : vector<1x8x32xf32> to vector<8x32xf32>
      %403 = vector.shape_cast %369 : vector<8x32xf32> to vector<1x8x32xf32>
      tpu.vector_store %arg15[%c0_168, %c0_169, %c0_170], %403 {strides = array<i32>} : memref<2x8x32xf32, #tpu.memory_space<vmem>>, vector<1x8x32xf32>,
      %c0_171 = arith.constant 0 : index
      %c0_172 = arith.constant 0 : index
      %c0_173 = arith.constant 0 : index
      %404 = vector.load %arg16[%c0_171, %c0_172, %c0_173] : memref<2x8x32xf32, #tpu.memory_space<vmem>>, vector<1x8x32xf32>
      %405 = vector.shape_cast %404 : vector<1x8x32xf32> to vector<8x32xf32>
      %406 = vector.shape_cast %367 : vector<8x32xf32> to vector<1x8x32xf32>
      tpu.vector_store %arg16[%c0_171, %c0_172, %c0_173], %406 {strides = array<i32>} : memref<2x8x32xf32, #tpu.memory_space<vmem>>, vector<1x8x32xf32>,
      %c1_174 = arith.constant 1 : index
      %c0_175 = arith.constant 0 : index
      %c0_176 = arith.constant 0 : index
      %407 = vector.load %arg15[%c1_174, %c0_175, %c0_176] : memref<2x8x32xf32, #tpu.memory_space<vmem>>, vector<1x8x32xf32>
      %408 = vector.shape_cast %407 : vector<1x8x32xf32> to vector<8x32xf32>
      %409 = vector.shape_cast %394 : vector<8x32xf32> to vector<1x8x32xf32>
      tpu.vector_store %arg15[%c1_174, %c0_175, %c0_176], %409 {strides = array<i32>} : memref<2x8x32xf32, #tpu.memory_space<vmem>>, vector<1x8x32xf32>,
      %c1_177 = arith.constant 1 : index
      %c0_178 = arith.constant 0 : index
      %c0_179 = arith.constant 0 : index
      %410 = vector.load %arg16[%c1_177, %c0_178, %c0_179] : memref<2x8x32xf32, #tpu.memory_space<vmem>>, vector<1x8x32xf32>
      %411 = vector.shape_cast %410 : vector<1x8x32xf32> to vector<8x32xf32>
      %412 = vector.shape_cast %392 : vector<8x32xf32> to vector<1x8x32xf32>
      tpu.vector_store %arg16[%c1_177, %c0_178, %c0_179], %412 {strides = array<i32>} : memref<2x8x32xf32, #tpu.memory_space<vmem>>, vector<1x8x32xf32>,
    } else {
    }
    %c0_i32_166 = arith.constant 0 : i32
    %398 = arith.cmpi eq, %arg0, %c0_i32_166 : i32
    %399 = arith.extui %398 : i1 to i32
    %c0_i32_167 = arith.constant 0 : i32
    %400 = arith.cmpi ne, %399, %c0_i32_167 : i32
    scf.if %400 {
      %c0_168 = arith.constant 0 : index
      %c0_169 = arith.constant 0 : index
      %c0_170 = arith.constant 0 : index
      %401 = vector.load %arg13[%c0_168, %c0_169, %c0_170] : memref<2x8x32xf32, #tpu.memory_space<vmem>>, vector<1x8x32xf32>
      %402 = vector.shape_cast %401 : vector<1x8x32xf32> to vector<8x32xf32>
      %403 = vector.shape_cast %369 : vector<8x32xf32> to vector<1x8x32xf32>
      tpu.vector_store %arg13[%c0_168, %c0_169, %c0_170], %403 {strides = array<i32>} : memref<2x8x32xf32, #tpu.memory_space<vmem>>, vector<1x8x32xf32>,
      %c0_171 = arith.constant 0 : index
      %c0_172 = arith.constant 0 : index
      %c0_173 = arith.constant 0 : index
      %404 = vector.load %arg14[%c0_171, %c0_172, %c0_173] : memref<2x8x32xf32, #tpu.memory_space<vmem>>, vector<1x8x32xf32>
      %405 = vector.shape_cast %404 : vector<1x8x32xf32> to vector<8x32xf32>
      %406 = vector.shape_cast %367 : vector<8x32xf32> to vector<1x8x32xf32>
      tpu.vector_store %arg14[%c0_171, %c0_172, %c0_173], %406 {strides = array<i32>} : memref<2x8x32xf32, #tpu.memory_space<vmem>>, vector<1x8x32xf32>,
      %c1_174 = arith.constant 1 : index
      %c0_175 = arith.constant 0 : index
      %c0_176 = arith.constant 0 : index
      %407 = vector.load %arg13[%c1_174, %c0_175, %c0_176] : memref<2x8x32xf32, #tpu.memory_space<vmem>>, vector<1x8x32xf32>
      %408 = vector.shape_cast %407 : vector<1x8x32xf32> to vector<8x32xf32>
      %409 = vector.shape_cast %394 : vector<8x32xf32> to vector<1x8x32xf32>
      tpu.vector_store %arg13[%c1_174, %c0_175, %c0_176], %409 {strides = array<i32>} : memref<2x8x32xf32, #tpu.memory_space<vmem>>, vector<1x8x32xf32>,
      %c1_177 = arith.constant 1 : index
      %c0_178 = arith.constant 0 : index
      %c0_179 = arith.constant 0 : index
      %410 = vector.load %arg14[%c1_177, %c0_178, %c0_179] : memref<2x8x32xf32, #tpu.memory_space<vmem>>, vector<1x8x32xf32>
      %411 = vector.shape_cast %410 : vector<1x8x32xf32> to vector<8x32xf32>
      %412 = vector.shape_cast %392 : vector<8x32xf32> to vector<1x8x32xf32>
      tpu.vector_store %arg14[%c1_177, %c0_178, %c0_179], %412 {strides = array<i32>} : memref<2x8x32xf32, #tpu.memory_space<vmem>>, vector<1x8x32xf32>,
      %c0_180 = arith.constant 0 : index
      %c0_181 = arith.constant 0 : index
      %413 = vector.load %arg8[%c0_180, %c0_181] : memref<32x128xf32, #tpu.memory_space<vmem>>, vector<32x128xf32>
      %cst_182 = arith.constant dense<0.000000e+00> : vector<8x128xf32>
      %414 = tpu.matmul %394, %413, %cst_182 {dimension_numbers = #tpu.dot_dimension_numbers<[1], [0], [0], [1], [0, 0, 1, 1], [], []>} : vector<8x32xf32>, vector<32x128xf32>, vector<8x128xf32> -> vector<8x128xf32>
      %c0_183 = arith.constant 0 : index
      %c0_184 = arith.constant 0 : index
      %415 = vector.load %arg9[%c0_183, %c0_184] : memref<1x128xf32, #tpu.memory_space<vmem>>, vector<1x128xf32>
      %416 = vector.broadcast %415 : vector<1x128xf32> to vector<8x128xf32>
      %417 = arith.addf %414, %416 : vector<8x128xf32>
      %cst_185 = arith.constant 0.000000e+00 : f32
      %418 = vector.broadcast %cst_185 : f32 to vector<8x128xf32>
      %419 = arith.maximumf %417, %418 : vector<8x128xf32>
      %c0_186 = arith.constant 0 : index
      %c0_187 = arith.constant 0 : index
      %420 = vector.load %arg10[%c0_186, %c0_187] : memref<128x128xf32, #tpu.memory_space<vmem>>, vector<128x128xf32>
      %cst_188 = arith.constant dense<0.000000e+00> : vector<8x128xf32>
      %421 = tpu.matmul %419, %420, %cst_188 {dimension_numbers = #tpu.dot_dimension_numbers<[1], [0], [0], [1], [0, 0, 1, 1], [], []>} : vector<8x128xf32>, vector<128x128xf32>, vector<8x128xf32> -> vector<8x128xf32>
      %c0_189 = arith.constant 0 : index
      %c0_190 = arith.constant 0 : index
      %422 = vector.load %arg11[%c0_189, %c0_190] : memref<1x128xf32, #tpu.memory_space<vmem>>, vector<1x128xf32>
      %423 = vector.broadcast %422 : vector<1x128xf32> to vector<8x128xf32>
      %424 = arith.addf %421, %423 : vector<8x128xf32>
      %c0_191 = arith.constant 0 : index
      %c0_192 = arith.constant 0 : index
      %425 = vector.load %arg12[%c0_191, %c0_192] : memref<8x128xf32, #tpu.memory_space<vmem>>, vector<8x128xf32>
      tpu.vector_store %arg12[%c0_191, %c0_192], %424 {strides = array<i32>} : memref<8x128xf32, #tpu.memory_space<vmem>>, vector<8x128xf32>,
    } else {
    }
    return
  }
  func.func @transform_0(%arg0: i32) -> (i32, i32, i32) {
    %c0_i32 = arith.constant 0 : i32
    %c0_i32_0 = arith.constant 0 : i32
    %c0_i32_1 = arith.constant 0 : i32
    return %arg0, %c0_i32, %c0_i32_0 : i32, i32, i32
  }
  func.func @transform_1(%arg0: i32) -> (i32, i32, i32) {
    %c0_i32 = arith.constant 0 : i32
    %c0_i32_0 = arith.constant 0 : i32
    %c0_i32_1 = arith.constant 0 : i32
    %c0_i32_2 = arith.constant 0 : i32
    return %c0_i32, %c0_i32_0, %c0_i32_1 : i32, i32, i32
  }
  func.func @transform_2(%arg0: i32) -> (i32, i32, i32) {
    %c0_i32 = arith.constant 0 : i32
    %c0_i32_0 = arith.constant 0 : i32
    %c0_i32_1 = arith.constant 0 : i32
    %c0_i32_2 = arith.constant 0 : i32
    return %c0_i32, %c0_i32_0, %c0_i32_1 : i32, i32, i32
  }
  func.func @transform_3(%arg0: i32) -> (i32, i32) {
    %c0_i32 = arith.constant 0 : i32
    %c0_i32_0 = arith.constant 0 : i32
    %c0_i32_1 = arith.constant 0 : i32
    return %c0_i32, %c0_i32_0 : i32, i32
  }
  func.func @transform_4(%arg0: i32) -> (i32, i32) {
    %c0_i32 = arith.constant 0 : i32
    %c0_i32_0 = arith.constant 0 : i32
    %c0_i32_1 = arith.constant 0 : i32
    return %c0_i32, %c0_i32_0 : i32, i32
  }
  func.func @transform_5(%arg0: i32) -> (i32, i32) {
    %c0_i32 = arith.constant 0 : i32
    %c0_i32_0 = arith.constant 0 : i32
    %c0_i32_1 = arith.constant 0 : i32
    return %c0_i32, %c0_i32_0 : i32, i32
  }
  func.func @transform_6(%arg0: i32) -> (i32, i32) {
    %c0_i32 = arith.constant 0 : i32
    %c0_i32_0 = arith.constant 0 : i32
    %c0_i32_1 = arith.constant 0 : i32
    return %c0_i32, %c0_i32_0 : i32, i32
  }
  func.func @transform_7(%arg0: i32) -> (i32, i32) {
    %c0_i32 = arith.constant 0 : i32
    %c0_i32_0 = arith.constant 0 : i32
    %c0_i32_1 = arith.constant 0 : i32
    return %c0_i32, %c0_i32_0 : i32, i32
  }
  func.func @transform_8(%arg0: i32) -> (i32, i32) {
    %c0_i32 = arith.constant 0 : i32
    %c0_i32_0 = arith.constant 0 : i32
    %c0_i32_1 = arith.constant 0 : i32
    return %c0_i32, %c0_i32_0 : i32, i32
  }
  func.func @transform_9(%arg0: i32) -> (i32, i32) {
    %c0_i32 = arith.constant 0 : i32
    %c0_i32_0 = arith.constant 0 : i32
    %c0_i32_1 = arith.constant 0 : i32
    return %c0_i32, %c0_i32_0 : i32, i32
  }
  func.func @transform_10(%arg0: i32) -> (i32, i32) {
    %c0_i32 = arith.constant 0 : i32
    %c0_i32_0 = arith.constant 0 : i32
    %c0_i32_1 = arith.constant 0 : i32
    return %c0_i32, %c0_i32_0 : i32, i32
  }
  func.func @transform_11(%arg0: i32) -> (i32, i32) {
    %c0_i32 = arith.constant 0 : i32
    %c0_i32_0 = arith.constant 0 : i32
    %c0_i32_1 = arith.constant 0 : i32
    return %c0_i32, %c0_i32_0 : i32, i32
  }
  func.func @transform_12(%arg0: i32) -> (i32, i32, i32) {
    %c0_i32 = arith.constant 0 : i32
    %c0_i32_0 = arith.constant 0 : i32
    %c0_i32_1 = arith.constant 0 : i32
    %c0_i32_2 = arith.constant 0 : i32
    return %c0_i32, %c0_i32_0, %c0_i32_1 : i32, i32, i32
  }
  func.func @transform_13(%arg0: i32) -> (i32, i32, i32) {
    %c0_i32 = arith.constant 0 : i32
    %c0_i32_0 = arith.constant 0 : i32
    %c0_i32_1 = arith.constant 0 : i32
    %c0_i32_2 = arith.constant 0 : i32
    return %c0_i32, %c0_i32_0, %c0_i32_1 : i32, i32, i32
  }
}

</mosaic_0001>

<bundles_post_ra>
// kernel: tpu_custom_call.1
= control target key start
LH: loop header
LB: loop body
LE: loop exit
PB: predicated region body
PF: predicated region fallthrough
CT: control target
= control target key end

     0   :  { %19 = vsyncpa [#allocation5], 0  ;;  %s4331_s0 = inlined_call_operand.hbm [shape: f32[8,8,128], index: 0, kind: input, shape index: {}]   ;;  %s4332_s1 = inlined_call_operand.hbm [shape: f32[2,8,32], index: 1, kind: input, shape index: {}]   ;;  %s4333_s2 = inlined_call_operand.hbm [shape: f32[2,8,32], index: 2, kind: input, shape index: {}]   ;;  %s4334_s3 = inlined_call_operand.hbm [shape: f32[32,128], index: 3, kind: input, shape index: {}]   ;;  %s4335_s4 = inlined_call_operand.hbm [shape: f32[32,128], index: 4, kind: input, shape index: {}]   ;;  %s4336_s5 = inlined_call_operand.hbm [shape: f32[32,128], index: 5, kind: input, shape index: {}]   ;;  %s4337_s6 = inlined_call_operand.vmem [shape: f32[8,128], index: 6, kind: input, shape index: {}]   ;;  %s4338_s7 = inlined_call_operand.hbm [shape: f32[32,128], index: 7, kind: input, shape index: {}]   ;;  %s4339_s8 = inlined_call_operand.vmem [shape: f32[1,128], index: 8, kind: input, shape index: {}]   ;;  %s4340_s9 = inlined_call_operand.hbm [shape: f32[128,128], index: 9, kind: input, shape index: {}]   ;;  %s4341_s10 = inlined_call_operand.vmem [shape: f32[1,128], index: 10, kind: input, shape index: {}]   ;;  %s4342_s11 = inlined_call_operand.hbm [shape: f32[8,128], index: 11, kind: output, shape index: {0}]   ;;  %s4343_s12 = inlined_call_operand.hbm [shape: f32[2,8,32], index: 12, kind: output, shape index: {1}]   ;;  %s4344_s13 = inlined_call_operand.hbm [shape: f32[2,8,32], index: 13, kind: output, shape index: {2}]  }
   0x1   :  { %20 = vsyncpa [#allocation8], 0 }
   0x2   :  { %21 = vsyncpa [#allocation11], 0 }
   0x3   :  { %22 = vsyncpa [#allocation14], 0 }
   0x4   :  { %23 = vsyncpa [#allocation17], 0 }
   0x5   :  { %24 = vsyncpa [#allocation6], 0 }
   0x6   :  { %25 = vsyncpa [#allocation20], 0  ;;  %s3712_s25 = smov [#allocation7]   ;;  %s3713_s27 = smov [#allocation10]  }
   0x7   :  { %s43_s26 = sshll.u32 %s3712_s25, 4  ;;  %s67_s28 = sshll.u32 %s3713_s27, 4  ;;  %s44_s26 = int_to_ptr.vmem [resolvable:$true] %s43_s26  ;;  %s3801_s28 = int_to_ptr.vmem [resolvable:$true] %s67_s28 }
   0x8   :  { %s3456_s14 = scalar_lea.hbm %s4332_s1, 256 }
   0x9   :  { %p3457_p0 = scmp.ne.s32.totalorder %s4332_s1, %s3456_s14  ;;  %p3460_p1 = scmp.lt.u32.totalorder %s3456_s14, %s4332_s1 }
   0xb   :  { %p3462_p2 = pnand %p3460_p1, %p3457_p0 }
   0xd   :  { %3465 = shalt.err (!%p3462_p2)
}
   0xe   :  { %s3466_s19 = scalar_lea.vmem %s44_s26, 256  ;;  %p3471_p4 = scmp.lt.s32.totalorder %s44_s26, %s44_s26 }
   0xf   :  { %p3467_p3 = scmp.ne.s32.totalorder %s44_s26, %s3466_s19  ;;  %p3472_p5 = scmp.lt.s32.totalorder %s3466_s19, %s3466_s19 }
  0x11   :  { %p3473_p6 = por %p3472_p5, %p3471_p4 }
  0x13   :  { %p3474_p7 = pnand %p3473_p6, %p3467_p3 }
  0x15   :  { %3477 = shalt.err (!%p3474_p7)
}
  0x16   :  { %s3714_s20 = smov 128   ;;  %s3715_s21 = smov 8  }
  0x17   :  { %49 = dma.hbm_to_vmem [thread:$0]  %s4332_s1, 256, %s44_s26, [#allocation8], %s3714_s20, %s3714_s20, %s3715_s21  }
  0x18   :  { %s3478_s27 = scalar_lea.hbm %s4334_s3, 512 }
  0x19   :  { %p3479_p8 = scmp.ne.s32.totalorder %s4334_s3, %s3478_s27  ;;  %p3482_p9 = scmp.lt.u32.totalorder %s3478_s27, %s4334_s3 }
  0x1b   :  { %p3484_p10 = pnand %p3482_p9, %p3479_p8 }
  0x1d   :  { %3487 = shalt.err (!%p3484_p10)
}
  0x1e   :  { %s3488_s16 = scalar_lea.vmem %s3801_s28, 512  ;;  %p3493_p12 = scmp.lt.s32.totalorder %s3801_s28, %s3801_s28 }
  0x1f   :  { %p3489_p11 = scmp.ne.s32.totalorder %s3801_s28, %s3488_s16  ;;  %p3494_p13 = scmp.lt.s32.totalorder %s3488_s16, %s3488_s16 }
  0x21   :  { %p3495_p0 = por %p3494_p13, %p3493_p12 }
  0x23   :  { %p3496_p1 = pnand %p3495_p0, %p3489_p11 }
  0x25   :  { %3499 = shalt.err (!%p3496_p1)
}
  0x26   :  { %73 = dma.hbm_to_vmem [thread:$0]  %s4334_s3, 512, %s3801_s28, [#allocation11], %s3714_s20, %s3714_s20, %s3715_s21  }
  0x27   :  { %s3716_s17 = smov [#allocation13]   ;;  %s3717_s19 = smov [#allocation4]  }
  0x28   :  { %s91_s18 = sshll.u32 %s3716_s17, 4  ;;  %s31_s22 = sshll.u32 %s3717_s19, 4  ;;  %s92_s18 = int_to_ptr.vmem [resolvable:$true] %s91_s18  ;;  %s3838_s22 = int_to_ptr.vmem [resolvable:$true] %s31_s22 }
  0x29   :  { %s3500_s25 = scalar_lea.hbm %s4336_s5, 512 }
  0x2a   :  { %p3501_p2 = scmp.ne.s32.totalorder %s4336_s5, %s3500_s25  ;;  %p3504_p3 = scmp.lt.u32.totalorder %s3500_s25, %s4336_s5 }
  0x2c   :  { %p3506_p4 = pnand %p3504_p3, %p3501_p2 }
  0x2e   :  { %3509 = shalt.err (!%p3506_p4)
}
  0x2f   :  { %s3510_s3 = scalar_lea.vmem %s92_s18, 512  ;;  %p3515_p6 = scmp.lt.s32.totalorder %s92_s18, %s92_s18 }
  0x30   :  { %p3511_p5 = scmp.ne.s32.totalorder %s92_s18, %s3510_s3  ;;  %p3516_p7 = scmp.lt.s32.totalorder %s3510_s3, %s3510_s3 }
  0x32   :  { %p3517_p8 = por %p3516_p7, %p3515_p6 }
  0x34   :  { %p3518_p9 = pnand %p3517_p8, %p3511_p5 }
  0x36   :  { %3521 = shalt.err (!%p3518_p9)
}
  0x37   :  { %97 = dma.hbm_to_vmem [thread:$0]  %s4336_s5, 512, %s92_s18, [#allocation14], %s3714_s20, %s3714_s20, %s3715_s21  }
  0x38   :  { %s3522_s26 = scalar_lea.hbm %s4331_s0, 1024 }
  0x39   :  { %p3523_p10 = scmp.ne.s32.totalorder %s4331_s0, %s3522_s26  ;;  %p3526_p11 = scmp.lt.u32.totalorder %s3522_s26, %s4331_s0 }
  0x3b   :  { %p3528_p12 = pnand %p3526_p11, %p3523_p10 }
  0x3d   :  { %3531 = shalt.err (!%p3528_p12)
}
  0x3e   :  { %s3532_s25 = scalar_lea.vmem %s3838_s22, 1024  ;;  %p3537_p0 = scmp.lt.s32.totalorder %s3838_s22, %s3838_s22 }
  0x3f   :  { %p3533_p13 = scmp.ne.s32.totalorder %s3838_s22, %s3532_s25  ;;  %p3538_p1 = scmp.lt.s32.totalorder %s3532_s25, %s3532_s25 }
  0x41   :  { %p3539_p2 = por %p3538_p1, %p3537_p0 }
  0x43   :  { %p3540_p3 = pnand %p3539_p2, %p3533_p13 }
  0x45   :  { %3543 = shalt.err (!%p3540_p3)
}
  0x46   :  { %37 = dma.hbm_to_vmem [thread:$0]  %s4331_s0, 1024, %s3838_s22, [#allocation5], %s3714_s20, %s3714_s20, %s3715_s21  }
  0x47   :  { %s3718_s27 = smov [#allocation9]   ;;  %s3719_s30 = smov [#allocation12]  }
  0x48   :  { %s55_s29 = sshll.u32 %s3718_s27, 4  ;;  %s79_s14 = sshll.u32 %s3719_s30, 4  ;;  %s56_s29 = int_to_ptr.vmem [resolvable:$true] %s55_s29  ;;  %s3875_s14 = int_to_ptr.vmem [resolvable:$true] %s79_s14 }
  0x49   :  { %s3544_s15 = scalar_lea.hbm %s4333_s2, 256 }
  0x4a   :  { %p3545_p4 = scmp.ne.s32.totalorder %s4333_s2, %s3544_s15  ;;  %p3548_p5 = scmp.lt.u32.totalorder %s3544_s15, %s4333_s2 }
  0x4c   :  { %p3550_p6 = pnand %p3548_p5, %p3545_p4 }
  0x4e   :  { %3553 = shalt.err (!%p3550_p6)
}
  0x4f   :  { %s3554_s0 = scalar_lea.vmem %s56_s29, 256  ;;  %p3559_p8 = scmp.lt.s32.totalorder %s56_s29, %s56_s29 }
  0x50   :  { %p3555_p7 = scmp.ne.s32.totalorder %s56_s29, %s3554_s0  ;;  %p3560_p9 = scmp.lt.s32.totalorder %s3554_s0, %s3554_s0 }
  0x52   :  { %p3561_p10 = por %p3560_p9, %p3559_p8 }
  0x54   :  { %p3562_p11 = pnand %p3561_p10, %p3555_p7 }
  0x56   :  { %3565 = shalt.err (!%p3562_p11)
}
  0x57   :  { %61 = dma.hbm_to_vmem [thread:$0]  %s4333_s2, 256, %s56_s29, [#allocation8], %s3714_s20, %s3714_s20, %s3715_s21  }
  0x58   :  { %s3566_s25 = scalar_lea.hbm %s4335_s4, 512 }
  0x59   :  { %p3567_p12 = scmp.ne.s32.totalorder %s4335_s4, %s3566_s25  ;;  %p3570_p13 = scmp.lt.u32.totalorder %s3566_s25, %s4335_s4 }
  0x5b   :  { %p3572_p0 = pnand %p3570_p13, %p3567_p12 }
  0x5d   :  { %3575 = shalt.err (!%p3572_p0)
}
  0x5e   :  { %s3576_s3 = scalar_lea.vmem %s3875_s14, 512  ;;  %p3581_p2 = scmp.lt.s32.totalorder %s3875_s14, %s3875_s14 }
  0x5f   :  { %p3577_p1 = scmp.ne.s32.totalorder %s3875_s14, %s3576_s3  ;;  %p3582_p3 = scmp.lt.s32.totalorder %s3576_s3, %s3576_s3 }
  0x61   :  { %p3583_p4 = por %p3582_p3, %p3581_p2 }
  0x63   :  { %p3584_p5 = pnand %p3583_p4, %p3577_p1 }
  0x65   :  { %3587 = shalt.err (!%p3584_p5)
}
  0x66   :  { %85 = dma.hbm_to_vmem [thread:$0]  %s4335_s4, 512, %s3875_s14, [#allocation11], %s3714_s20, %s3714_s20, %s3715_s21  }
  0x67   :  { %s3720_s28 = smov [#allocation15]   ;;  %s3721_s16 = smov [#allocation16]  }
  0x68   :  { %s105_s15 = sshll.u32 %s3720_s28, 4  ;;  %s119_s1 = sshll.u32 %s3721_s16, 4  ;;  %s106_s15 = int_to_ptr.vmem [resolvable:$true] %s105_s15  ;;  %s3912_s1 = int_to_ptr.vmem [resolvable:$true] %s119_s1 }
  0x69   :  { %s3588_s0 = scalar_lea.hbm %s4338_s7, 512 }
  0x6a   :  { %p3589_p6 = scmp.ne.s32.totalorder %s4338_s7, %s3588_s0  ;;  %p3592_p7 = scmp.lt.u32.totalorder %s3588_s0, %s4338_s7 }
  0x6c   :  { %p3594_p8 = pnand %p3592_p7, %p3589_p6 }
  0x6e   :  { %3597 = shalt.err (!%p3594_p8)
}
  0x6f   :  { %s3598_s4 = scalar_lea.vmem %s106_s15, 512  ;;  %p3603_p10 = scmp.lt.s32.totalorder %s106_s15, %s106_s15 }
  0x70   :  { %p3599_p9 = scmp.ne.s32.totalorder %s106_s15, %s3598_s4  ;;  %p3604_p11 = scmp.lt.s32.totalorder %s3598_s4, %s3598_s4 }
  0x72   :  { %p3605_p12 = por %p3604_p11, %p3603_p10 }
  0x74   :  { %p3606_p13 = pnand %p3605_p12, %p3599_p9 }
  0x76   :  { %3609 = shalt.err (!%p3606_p13)
}
  0x77   :  { %111 = dma.hbm_to_vmem [thread:$0]  %s4338_s7, 512, %s106_s15, [#allocation14], %s3714_s20, %s3714_s20, %s3715_s21  }
  0x78   :  { %s3610_s27 = scalar_lea.hbm %s4340_s9, 2048 }
  0x79   :  { %p3611_p0 = scmp.ne.s32.totalorder %s4340_s9, %s3610_s27  ;;  %p3614_p1 = scmp.lt.u32.totalorder %s3610_s27, %s4340_s9 }
  0x7b   :  { %p3616_p2 = pnand %p3614_p1, %p3611_p0 }
  0x7d   :  { %3619 = shalt.err (!%p3616_p2)
}
  0x7e   :  { %s3620_s28 = scalar_lea.vmem %s3912_s1, 2048  ;;  %p3625_p4 = scmp.lt.s32.totalorder %s3912_s1, %s3912_s1 }
  0x7f   :  { %p3621_p3 = scmp.ne.s32.totalorder %s3912_s1, %s3620_s28  ;;  %p3626_p5 = scmp.lt.s32.totalorder %s3620_s28, %s3620_s28 }
  0x81   :  { %p3627_p6 = por %p3626_p5, %p3625_p4 }
  0x83   :  { %p3628_p7 = pnand %p3627_p6, %p3621_p3 }
  0x85   :  { %3631 = shalt.err (!%p3628_p7)
}
  0x86   :  { %125 = dma.hbm_to_vmem [thread:$0]  %s4340_s9, 2048, %s3912_s1, [#allocation17], %s3714_s20, %s3714_s20, %s3715_s21  }
  0x87   :  { %3698 = dma.done.wait [#allocation5], 1024  }
  0x88   :  { %3699 = vsyncadd [#allocation5], 4294966272 }
  0x89   :  { %3700 = dma.done.wait [#allocation8], 512  }
  0x8a   :  { %3701 = vsyncadd [#allocation8], 4294966784 }
  0x8b   :  { %3702 = dma.done.wait [#allocation11], 1024  }
  0x8c   :  { %3703 = vsyncadd [#allocation11], 4294966272 }
  0x8d   :  { %3704 = dma.done.wait [#allocation14], 1024  }
  0x8e   :  { %3705 = vsyncadd [#allocation14], 4294966272 }
  0x8f   :  { %3706 = dma.done.wait [#allocation17], 2048  }
  0x90   :  { %3707 = vsyncadd [#allocation17], 4294965248  ;;  %v3722_v0 = vmov 0.0|0.0   ;;  %vm3723_vm0 = vmmov 0   ;;  %v3724_v1 = vmov 0.0   ;;  %vm158_vm1 = vcmask 261120  }
  0x91   :  { %3167 = vmatprep.subr.bf16.mxu0 %v3722_v0  ;;  %2865 = vmatprep.mubr.msk.f32.mxu0 %vm3723_vm0, %v3724_v1  ;;  %v172_v2 = vld [vmem:[#allocation10] sm:$0xff]  ;;  %v173_v3 = vld [vmem:[#allocation10 + $0x8] sm:$0xff]  ;;  %v174_v4 = vld [vmem:[#allocation10 + $0x10] sm:$0xff]  ;;  %s3725_s9 = smov 64   ;;  %s3726_s16 = smov 32  }
  0x92   :  { %3185 = vmatprep.subr.bf16.mxu1 %v3722_v0  ;;  %2898 = vmatprep.mubr.msk.f32.mxu1 %vm3723_vm0, %v3724_v1  ;;  %v3955_v5 = vpack.c.bf16 %v173_v3, %v172_v2  ;;  %v175_v6 = vld [vmem:[#allocation10 + $0x18] sm:$0xff]  ;;  %v156_v7 = vld [vmem:[#allocation7] sm:$0xff]  ;;  %v161_v10 = vld [vmem:[#allocation9] sm:$0xff]  ;;  %s3728_s22 = smov [#allocation19]  }
  0x93   :  { %159 = vst.msk [vmem:[#allocation2] sm:$0xff] %vm158_vm1, %v156_v7  ;;  %v3959_v8 = vpack.c.bf16 %v175_v6, %v174_v4  ;;  %163 = vst.msk [vmem:[#allocation3] sm:$0xff] %vm158_vm1, %v161_v10  ;;  %v171_v11 = vld [vmem:[#allocation4] sm:$0xff]  ;;  %v285_v29 = vld [vmem:[#allocation13 + $0x8] sm:$0xff]  ;;  %s2621_s19 = sshll.u32 %s3728_s22, 4  ;;  %s2622_s19 = int_to_ptr.vmem [resolvable:$true] %s2621_s19 }
  0x94   :  { %3169 = vmatpush3.bf16.msra.mxu0 %v3955_v5  ;;  %3187 = vmatpush3.bf16.msra.mxu1 %v3955_v5  ;;  %v284_v28 = vld [vmem:[#allocation13] sm:$0xff]  ;;  %v286_v30 = vld [vmem:[#allocation13 + $0x10] sm:$0xff]  ;;  %v287_v32 = vld [vmem:[#allocation13 + $0x18] sm:$0xff]  ;;  %s3632_s23 = scalar_lea.vmem %s2622_s19, 256  ;;  %p3637_p9 = scmp.lt.s32.totalorder %s2622_s19, %s2622_s19 }
  0x95   :  { %3170 = vmatprep.subr.bf16.mxu0 %v3722_v0  ;;  %3188 = vmatprep.subr.bf16.mxu1 %v3722_v0  ;;  %v3978_v31 = vpack.c.bf16 %v285_v29, %v284_v28  ;;  %v157_v33 = vld [vmem:[#allocation7 + $0x8] sm:$0xff]  ;;  %v3982_v34 = vpack.c.bf16 %v287_v32, %v286_v30  ;;  %v280_v35 = vld [vmem:[#allocation12] sm:$0xff]  ;;  %v282_v38 = vld [vmem:[#allocation12 + $0x10] sm:$0xff]  ;;  %p3633_p8 = scmp.ne.s32.totalorder %s2622_s19, %s3632_s23  ;;  %p3638_p10 = scmp.lt.s32.totalorder %s3632_s23, %s3632_s23 }
  0x96   :  { %160 = vst.msk [vmem:[#allocation2 + $0x8] sm:$0xff] %vm158_vm1, %v157_v33  ;;  %v281_v36 = vld [vmem:[#allocation12 + $0x8] sm:$0xff]  ;;  %v283_v39 = vld [vmem:[#allocation12 + $0x18] sm:$0xff]  ;;  %v4018_v51 = vld [vmem:[%s4337_s6] sm:$0xff]  ;;  %s3727_s6 = smov 96  }
  0x97   :  { %v3986_v37 = vpack.c.bf16 %v281_v36, %v280_v35  ;;  %v3992_v42 = vpack.c.bf16 %v283_v39, %v282_v38  ;;  %v162_v48 = vld [vmem:[#allocation9 + $0x8] sm:$0xff]  ;;  %v468_v49 = vld [vmem:[#allocation4 + $0x8] sm:$0xff]  ;;  %p3639_p11 = por %p3638_p10, %p3637_p9 }
  0x98   :  { %3172 = vmatpush3.bf16.msra.mxu0 %v3959_v8  ;;  %3190 = vmatpush3.bf16.msra.mxu1 %v3959_v8  ;;  %164 = vst.msk [vmem:[#allocation3 + $0x8] sm:$0xff] %vm158_vm1, %v162_v48 }
  0x99   :  { %3173 = vmatprep.subr.bf16.mxu0 %v3722_v0  ;;  %3197 = vmatprep.subr.bf16.mxu1 %v3722_v0  ;;  %p3640_p12 = pnand %p3639_p11, %p3633_p8 }
  0x9a   :  { %v165_v9 = vld [vmem:[#allocation2] sm:$0xff]  ;;  %v168_v21 = vld [vmem:[#allocation3] sm:$0xff] }
  0x9b   :  { %2866 = vmatmul.mubr.msk.f32.vlgmr.msra.gmra.mrb[0].mxu0 %vm158_vm1, %v165_v9 }
  0x9c   :  { %2876 = vmatprep.mubr.msk.f32.mxu0 %vm3723_vm0, %v3724_v1  ;;  %3175 = vmatpush3.bf16.msra.mxu0 %v3978_v31 }
  0x9d   :  { %3176 = vmatprep.subr.bf16.mxu0 %v3722_v0  ;;  %v167_v40 = vld [vmem:[#allocation2 + $0x8] sm:$0xff] }
  0x9f   :  { %v170_v10 = vld [vmem:[#allocation3 + $0x8] sm:$0xff] }
  0xa0   :  { %3178 = vmatpush3.bf16.msra.mxu0 %v3982_v34 }
  0xa1   :  { %3179 = vmatprep.subr.bf16.mxu0 %v3722_v0 }
  0xa3   :  { %2877 = vmatmul.mubr.msk.f32.vlgmr.msra.gmra.mrb[2].mxu0 %vm158_vm1, %v167_v40  ;;  %v742_v40 = vld [vmem:[#allocation4 + $0x10] sm:$0xff] }
  0xa4   :  { %3181 = vmatpush3.bf16.msra.mxu0 %v3986_v37  ;;  %2887 = vmatprep.mubr.msk.f32.mxu0 %vm3723_vm0, %v3724_v1 }
  0xa5   :  { %3182 = vmatprep.subr.bf16.mxu0 %v3722_v0 }
  0xa8   :  { %3184 = vmatpush3.bf16.msra.mxu0 %v3992_v42 }
  0xa9   :  { %3191 = vmatprep.subr.bf16.mxu0 %v3722_v0 }
 0x16e   :  { %v246_v12 = vpop.f32.mrb[0].mxu0 }
 0x16f   :  { %v250_v13 = vadd.f32 %v246_v12, %v171_v11  ;;  %v2867_v14 = vpop.f32.mrb[1].mxu0 }
 0x171   :  { %v2657_v15 = vmul.f32 -1.442695, %v250_v13 }
 0x173   :  { %3360 = vpow2.f32 %v2657_v15 }
 0x176   :  { %v357_v45 = vpop.f32.mrb[2].mxu0 }
 0x177   :  { %v2878_v46 = vpop.f32.mrb[3].mxu0 }
 0x17d   :  { %v3361_v16 = vpop.eup %3360 }
 0x17e   :  { %v254_v17 = vadd.f32 1.0, %v3361_v16 }
 0x180   :  { %3362 = vrcp.f32 %v254_v17 }
 0x18a   :  { %v3363_v18 = vpop.eup %3362 }
 0x18b   :  { %v257_v19 = vmul.f32 2.0, %v3363_v18 }
 0x18d   :  { %v2658_v20 = vadd.f32 -1.0, %v257_v19 }
 0x18f   :  { %265 = vrot.lane.b32.xlu0 %v2658_v20, %s3725_s9 }
 0x193   :  { %260 = vrot.lane.b32.xlu0 %v168_v21, %s3726_s16 }
 0x201   :  { %v266_v22 = vpop.permute.xlu0 %265 }
 0x202   :  { %v268_v23 = vmul.f32 %v3363_v18, %v266_v22 }
 0x204   :  { %270 = vrot.lane.b32.xlu1 %v268_v23, %s3726_s16 }
 0x205   :  { %v261_v24 = vpop.permute.xlu0 %260 }
 0x206   :  { %v263_v25 = vmul.f32 %v3363_v18, %v261_v24 }
 0x276   :  { %v271_v26 = vpop.permute.xlu1 %270 }
 0x277   :  { %v3975_v27 = vadd.f32 %v271_v26, %v263_v25 }
 0x279   :  { %3364 = vtanh.f32 %v3975_v27 }
 0x283   :  { %v3365_v41 = vpop.eup %3364 }
 0x284   :  { %276 = vrot.lane.b32.xlu1 %v3365_v41, %s3725_s9 }
 0x2f6   :  { %v277_v43 = vpop.permute.xlu1 %276 }
 0x2f7   :  { %v279_v44 = vmul.f32 %v3363_v18, %v277_v43 }
 0x2f9   :  { %362 = vrot.lane.b32.xlu0 %v279_v44, %s3726_s16 }
 0x36b   :  { %v363_v47 = vpop.permute.xlu0 %362 }
 0x36c   :  { %2888 = vmatmul.mubr.msk.f32.vlgmr.msra.gmra.mrb[4].mxu0 %vm158_vm1, %v363_v47  ;;  %2899 = vmatmul.mubr.msk.f32.vlgmr.msra.gmra.mrb[0].mxu1 %vm158_vm1, %v363_v47 }
 0x36d   :  { %3199 = vmatpush3.bf16.msra.mxu1 %v3986_v37  ;;  %3193 = vmatpush3.bf16.msra.mxu0 %v3978_v31 }
 0x36e   :  { %3200 = vmatprep.subr.bf16.mxu1 %v3722_v0  ;;  %3194 = vmatprep.subr.bf16.mxu0 %v3722_v0 }
 0x36f   :  { %2920 = vmatprep.mubr.msk.f32.mxu1 %vm3723_vm0, %v3724_v1  ;;  %2909 = vmatprep.mubr.msk.f32.mxu0 %vm3723_vm0, %v3724_v1 }
 0x371   :  { %3202 = vmatpush3.bf16.msra.mxu1 %v3992_v42  ;;  %3196 = vmatpush3.bf16.msra.mxu0 %v3982_v34 }
 0x372   :  { %3203 = vmatprep.subr.bf16.mxu0 %v3722_v0  ;;  %3209 = vmatprep.subr.bf16.mxu1 %v3722_v0 }
 0x43f   :  { %v432_v50 = vpop.f32.mrb[4].mxu0  ;;  %v535_v52 = vpop.f32.mrb[0].mxu1 }
 0x440   :  { %v433_v53 = vadd.f32 %v432_v50, %v357_v45  ;;  %v539_v54 = vadd.f32 %v535_v52, %v468_v49  ;;  %v2889_v55 = vpop.f32.mrb[5].mxu0  ;;  %v2900_v56 = vpop.f32.mrb[1].mxu1 }
 0x442   :  { %v437_v57 = vadd.f32 %v4018_v51, %v433_v53  ;;  %v2664_v58 = vmul.f32 -1.442695, %v539_v54 }
 0x444   :  { %v2661_v59 = vmul.f32 -1.442695, %v437_v57  ;;  %3366 = vpow2.f32 %v2664_v58 }
 0x446   :  { %3368 = vpow2.f32 %v2661_v59 }
 0x44e   :  { %v3367_v60 = vpop.eup %3366 }
 0x44f   :  { %v543_v61 = vadd.f32 1.0, %v3367_v60 }
 0x450   :  { %v3369_v62 = vpop.eup %3368 }
 0x451   :  { %v441_v63 = vadd.f32 1.0, %v3369_v62  ;;  %3370 = vrcp.f32 %v543_v61 }
 0x453   :  { %3372 = vrcp.f32 %v441_v63 }
 0x45b   :  { %v3371_v2 = vpop.eup %3370 }
 0x45c   :  { %v546_v3 = vmul.f32 2.0, %v3371_v2  ;;  %v548_v16 = vmul.f32 %v3371_v2, %v3975_v27 }
 0x45d   :  { %v3373_v4 = vpop.eup %3372 }
 0x45e   :  { %v2665_v6 = vadd.f32 -1.0, %v546_v3  ;;  %v444_v7 = vmul.f32 2.0, %v3373_v4 }
 0x460   :  { %550 = vrot.lane.b32.xlu0 %v2665_v6, %s3725_s9  ;;  %v2662_v9 = vadd.f32 -1.0, %v444_v7 }
 0x462   :  { %452 = vrot.lane.b32.xlu1 %v2662_v9, %s3725_s9 }
 0x466   :  { %447 = vrot.lane.b32.xlu1 %v170_v10, %s3726_s16 }
 0x4d2   :  { %v551_v11 = vpop.permute.xlu0 %550 }
 0x4d3   :  { %v553_v12 = vmul.f32 %v3371_v2, %v551_v11 }
 0x4d4   :  { %v453_v13 = vpop.permute.xlu1 %452 }
 0x4d5   :  { %v455_v14 = vmul.f32 %v3373_v4, %v453_v13  ;;  %555 = vrot.lane.b32.xlu1 %v553_v12, %s3726_s16 }
 0x4d7   :  { %457 = vrot.lane.b32.xlu0 %v455_v14, %s3726_s16 }
 0x4d8   :  { %v448_v15 = vpop.permute.xlu1 %447 }
 0x4d9   :  { %v450_v18 = vmul.f32 %v3373_v4, %v448_v15 }
 0x547   :  { %v556_v17 = vpop.permute.xlu1 %555 }
 0x548   :  { %v4027_v19 = vadd.f32 %v556_v17, %v548_v16 }
 0x549   :  { %v458_v20 = vpop.permute.xlu0 %457 }
 0x54a   :  { %3374 = vtanh.f32 %v4027_v19  ;;  %v4030_v21 = vadd.f32 %v458_v20, %v450_v18  ;;  %v1016_v18 = vld [vmem:[#allocation4 + $0x18] sm:$0xff] }
 0x54c   :  { %3376 = vtanh.f32 %v4030_v21 }
 0x554   :  { %v3375_v22 = vpop.eup %3374 }
 0x555   :  { %561 = vrot.lane.b32.xlu1 %v3375_v22, %s3725_s9 }
 0x556   :  { %v3377_v23 = vpop.eup %3376 }
 0x557   :  { %463 = vrot.lane.b32.xlu0 %v3377_v23, %s3725_s9 }
 0x5c7   :  { %v562_v24 = vpop.permute.xlu1 %561 }
 0x5c8   :  { %v564_v25 = vmul.f32 %v3371_v2, %v562_v24 }
 0x5c9   :  { %v464_v26 = vpop.permute.xlu0 %463 }
 0x5ca   :  { %v466_v27 = vmul.f32 %v3373_v4, %v464_v26  ;;  %641 = vrot.lane.b32.xlu1 %v564_v25, %s3726_s16 }
 0x5cc   :  { %566 = vrot.lane.b32.xlu0 %v466_v27, %s3726_s16 }
 0x63c   :  { %v642_v28 = vpop.permute.xlu1 %641 }
 0x63d   :  { %2921 = vmatmul.mubr.msk.f32.vlgmr.msra.gmra.mrb[2].mxu1 %vm158_vm1, %v642_v28 }
 0x63e   :  { %v567_v29 = vpop.permute.xlu0 %566  ;;  %3211 = vmatpush3.bf16.msra.mxu1 %v3978_v31  ;;  %2942 = vmatprep.mubr.msk.f32.mxu1 %vm3723_vm0, %v3724_v1 }
 0x63f   :  { %2910 = vmatmul.mubr.msk.f32.vlgmr.msra.gmra.mrb[6].mxu0 %vm158_vm1, %v567_v29  ;;  %3212 = vmatprep.subr.bf16.mxu1 %v3722_v0 }
 0x640   :  { %3205 = vmatpush3.bf16.msra.mxu0 %v3955_v5  ;;  %2931 = vmatprep.mubr.msk.f32.mxu0 %vm3723_vm0, %v3724_v1 }
 0x641   :  { %3206 = vmatprep.subr.bf16.mxu0 %v3722_v0 }
 0x642   :  { %3214 = vmatpush3.bf16.msra.mxu1 %v3982_v34 }
 0x643   :  { %3221 = vmatprep.subr.bf16.mxu1 %v3722_v0 }
 0x644   :  { %3208 = vmatpush3.bf16.msra.mxu0 %v3959_v8 }
 0x645   :  { %3215 = vmatprep.subr.bf16.mxu0 %v3722_v0 }
 0x647   :  { %2932 = vmatmul.mubr.msk.f32.vlgmr.msra.gmra.mrb[8].mxu0 %vm158_vm1, %v642_v28 }
 0x648   :  { %3217 = vmatpush3.bf16.msra.mxu0 %v3986_v37  ;;  %2953 = vmatprep.mubr.msk.f32.mxu0 %vm3723_vm0, %v3724_v1 }
 0x649   :  { %3218 = vmatprep.subr.bf16.mxu0 %v3722_v0 }
 0x64c   :  { %3220 = vmatpush3.bf16.msra.mxu0 %v3992_v42 }
 0x64d   :  { %3227 = vmatprep.subr.bf16.mxu0 %v3722_v0 }
 0x710   :  { %v711_v30 = vpop.f32.mrb[2].mxu1 }
 0x711   :  { %v2922_v32 = vpop.f32.mrb[3].mxu1 }
 0x712   :  { %v636_v33 = vpop.f32.mrb[6].mxu0 }
 0x713   :  { %v712_v35 = vadd.f32 %v711_v30, %v636_v33  ;;  %v2911_v36 = vpop.f32.mrb[7].mxu0 }
 0x715   :  { %v715_v38 = vadd.f32 %v712_v35, %v4018_v51 }
 0x717   :  { %v2668_v39 = vmul.f32 -1.442695, %v715_v38 }
 0x719   :  { %3378 = vpow2.f32 %v2668_v39 }
 0x71a   :  { %v809_v41 = vpop.f32.mrb[8].mxu0 }
 0x71b   :  { %v813_v43 = vadd.f32 %v809_v41, %v742_v40  ;;  %v2933_v44 = vpop.f32.mrb[9].mxu0 }
 0x71d   :  { %v2671_v45 = vmul.f32 -1.442695, %v813_v43 }
 0x71f   :  { %3380 = vpow2.f32 %v2671_v45 }
 0x723   :  { %v3379_v46 = vpop.eup %3378 }
 0x724   :  { %v719_v47 = vadd.f32 1.0, %v3379_v46 }
 0x726   :  { %3382 = vrcp.f32 %v719_v47 }
 0x729   :  { %v3381_v48 = vpop.eup %3380 }
 0x72a   :  { %v817_v49 = vadd.f32 1.0, %v3381_v48 }
 0x72c   :  { %3384 = vrcp.f32 %v817_v49 }
 0x730   :  { %v3383_v50 = vpop.eup %3382 }
 0x731   :  { %v722_v52 = vmul.f32 2.0, %v3383_v50  ;;  %v724_v61 = vmul.f32 %v3383_v50, %v4030_v21 }
 0x733   :  { %v2669_v53 = vadd.f32 -1.0, %v722_v52 }
 0x735   :  { %726 = vrot.lane.b32.xlu0 %v2669_v53, %s3725_s9 }
 0x736   :  { %v3385_v54 = vpop.eup %3384 }
 0x737   :  { %v820_v55 = vmul.f32 2.0, %v3385_v54  ;;  %v822_v2 = vmul.f32 %v3385_v54, %v4027_v19 }
 0x739   :  { %v2672_v56 = vadd.f32 -1.0, %v820_v55 }
 0x73b   :  { %824 = vrot.lane.b32.xlu1 %v2672_v56, %s3725_s9 }
 0x7a7   :  { %v727_v57 = vpop.permute.xlu0 %726 }
 0x7a8   :  { %v729_v58 = vmul.f32 %v3383_v50, %v727_v57 }
 0x7aa   :  { %731 = vrot.lane.b32.xlu0 %v729_v58, %s3726_s16 }
 0x7ad   :  { %v825_v59 = vpop.permute.xlu1 %824 }
 0x7ae   :  { %v827_v60 = vmul.f32 %v3385_v54, %v825_v59 }
 0x7b0   :  { %829 = vrot.lane.b32.xlu1 %v827_v60, %s3726_s16 }
 0x81c   :  { %v732_v62 = vpop.permute.xlu0 %731 }
 0x81d   :  { %v4064_v63 = vadd.f32 %v732_v62, %v724_v61 }
 0x81f   :  { %3386 = vtanh.f32 %v4064_v63 }
 0x822   :  { %v830_v3 = vpop.permute.xlu1 %829 }
 0x823   :  { %v4068_v4 = vadd.f32 %v830_v3, %v822_v2 }
 0x825   :  { %3388 = vtanh.f32 %v4068_v4 }
 0x829   :  { %v3387_v6 = vpop.eup %3386 }
 0x82a   :  { %737 = vrot.lane.b32.xlu0 %v3387_v6, %s3725_s9  ;;  %v1290_v6 = vld [vmem:[#allocation4 + $0x20] sm:$0xff] }
 0x82f   :  { %v3389_v7 = vpop.eup %3388 }
 0x830   :  { %835 = vrot.lane.b32.xlu1 %v3389_v7, %s3725_s9 }
 0x89c   :  { %v738_v9 = vpop.permute.xlu0 %737 }
 0x89d   :  { %v740_v10 = vmul.f32 %v3383_v50, %v738_v9 }
 0x89f   :  { %840 = vrot.lane.b32.xlu0 %v740_v10, %s3726_s16 }
 0x8a2   :  { %v836_v11 = vpop.permute.xlu1 %835 }
 0x8a3   :  { %v838_v12 = vmul.f32 %v3385_v54, %v836_v11 }
 0x8a5   :  { %915 = vrot.lane.b32.xlu1 %v838_v12, %s3726_s16 }
 0x911   :  { %v841_v13 = vpop.permute.xlu0 %840 }
 0x912   :  { %2943 = vmatmul.mubr.msk.f32.vlgmr.msra.gmra.mrb[4].mxu1 %vm158_vm1, %v841_v13 }
 0x913   :  { %3223 = vmatpush3.bf16.msra.mxu1 %v3955_v5  ;;  %2964 = vmatprep.mubr.msk.f32.mxu1 %vm3723_vm0, %v3724_v1 }
 0x914   :  { %3224 = vmatprep.subr.bf16.mxu1 %v3722_v0 }
 0x917   :  { %3226 = vmatpush3.bf16.msra.mxu1 %v3959_v8  ;;  %v916_v14 = vpop.permute.xlu1 %915 }
 0x918   :  { %2954 = vmatmul.mubr.msk.f32.vlgmr.msra.gmra.mrb[10].mxu0 %vm158_vm1, %v916_v14  ;;  %3233 = vmatprep.subr.bf16.mxu1 %v3722_v0 }
 0x919   :  { %3229 = vmatpush3.bf16.msra.mxu0 %v3978_v31  ;;  %2975 = vmatprep.mubr.msk.f32.mxu0 %vm3723_vm0, %v3724_v1 }
 0x91a   :  { %2965 = vmatmul.mubr.msk.f32.vlgmr.msra.gmra.mrb[6].mxu1 %vm158_vm1, %v916_v14  ;;  %3230 = vmatprep.subr.bf16.mxu0 %v3722_v0 }
 0x91b   :  { %3235 = vmatpush3.bf16.msra.mxu1 %v3986_v37  ;;  %2986 = vmatprep.mubr.msk.f32.mxu1 %vm3723_vm0, %v3724_v1 }
 0x91c   :  { %3236 = vmatprep.subr.bf16.mxu1 %v3722_v0 }
 0x91d   :  { %3232 = vmatpush3.bf16.msra.mxu0 %v3982_v34 }
 0x91e   :  { %3239 = vmatprep.subr.bf16.mxu0 %v3722_v0 }
 0x91f   :  { %3238 = vmatpush3.bf16.msra.mxu1 %v3992_v42 }
 0x920   :  { %3245 = vmatprep.subr.bf16.mxu1 %v3722_v0 }
 0x9e5   :  { %v910_v15 = vpop.f32.mrb[4].mxu1 }
 0x9e6   :  { %v2944_v16 = vpop.f32.mrb[5].mxu1 }
 0x9eb   :  { %v985_v17 = vpop.f32.mrb[10].mxu0 }
 0x9ec   :  { %v986_v19 = vadd.f32 %v985_v17, %v910_v15  ;;  %v2955_v20 = vpop.f32.mrb[11].mxu0 }
 0x9ed   :  { %v1083_v21 = vpop.f32.mrb[6].mxu1 }
 0x9ee   :  { %v989_v22 = vadd.f32 %v986_v19, %v4018_v51  ;;  %v1087_v23 = vadd.f32 %v1083_v21, %v1016_v18  ;;  %v2966_v24 = vpop.f32.mrb[7].mxu1 }
 0x9f0   :  { %v2675_v25 = vmul.f32 -1.442695, %v989_v22  ;;  %v2678_v26 = vmul.f32 -1.442695, %v1087_v23 }
 0x9f2   :  { %3390 = vpow2.f32 %v2675_v25 }
 0x9f3   :  { %3392 = vpow2.f32 %v2678_v26 }
 0x9fc   :  { %v3391_v27 = vpop.eup %3390 }
 0x9fd   :  { %v3393_v28 = vpop.eup %3392  ;;  %v993_v29 = vadd.f32 1.0, %v3391_v27 }
 0x9fe   :  { %v1091_v30 = vadd.f32 1.0, %v3393_v28 }
 0x9ff   :  { %3394 = vrcp.f32 %v993_v29 }
 0xa00   :  { %3396 = vrcp.f32 %v1091_v30 }
 0xa09   :  { %v3395_v32 = vpop.eup %3394 }
 0xa0a   :  { %v3397_v33 = vpop.eup %3396  ;;  %v996_v35 = vmul.f32 2.0, %v3395_v32  ;;  %v998_v45 = vmul.f32 %v3395_v32, %v4064_v63 }
 0xa0b   :  { %v1094_v36 = vmul.f32 2.0, %v3397_v33  ;;  %v1096_v46 = vmul.f32 %v3397_v33, %v4068_v4 }
 0xa0c   :  { %v2676_v38 = vadd.f32 -1.0, %v996_v35 }
 0xa0d   :  { %v2679_v39 = vadd.f32 -1.0, %v1094_v36 }
 0xa0e   :  { %1000 = vrot.lane.b32.xlu0 %v2676_v38, %s3725_s9 }
 0xa0f   :  { %1098 = vrot.lane.b32.xlu1 %v2679_v39, %s3725_s9 }
 0xa80   :  { %v1001_v40 = vpop.permute.xlu0 %1000 }
 0xa81   :  { %v1099_v41 = vpop.permute.xlu1 %1098  ;;  %v1003_v43 = vmul.f32 %v3395_v32, %v1001_v40 }
 0xa82   :  { %v1101_v44 = vmul.f32 %v3397_v33, %v1099_v41 }
 0xa83   :  { %1005 = vrot.lane.b32.xlu0 %v1003_v43, %s3726_s16 }
 0xa84   :  { %1103 = vrot.lane.b32.xlu1 %v1101_v44, %s3726_s16 }
 0xaf5   :  { %v1006_v47 = vpop.permute.xlu0 %1005 }
 0xaf6   :  { %v1104_v48 = vpop.permute.xlu1 %1103  ;;  %v4103_v49 = vadd.f32 %v1006_v47, %v998_v45 }
 0xaf7   :  { %v4105_v50 = vadd.f32 %v1104_v48, %v1096_v46 }
 0xaf8   :  { %3398 = vtanh.f32 %v4103_v49 }
 0xaf9   :  { %3400 = vtanh.f32 %v4105_v50 }
 0xb02   :  { %v3399_v52 = vpop.eup %3398 }
 0xb03   :  { %v3401_v53 = vpop.eup %3400  ;;  %1011 = vrot.lane.b32.xlu0 %v3399_v52, %s3725_s9 }
 0xb04   :  { %1109 = vrot.lane.b32.xlu1 %v3401_v53, %s3725_s9 }
 0xb75   :  { %v1012_v54 = vpop.permute.xlu0 %1011 }
 0xb76   :  { %v1110_v55 = vpop.permute.xlu1 %1109  ;;  %v1014_v56 = vmul.f32 %v3395_v32, %v1012_v54 }
 0xb77   :  { %v1112_v57 = vmul.f32 %v3397_v33, %v1110_v55 }
 0xb78   :  { %1114 = vrot.lane.b32.xlu0 %v1014_v56, %s3726_s16 }
 0xb79   :  { %1189 = vrot.lane.b32.xlu1 %v1112_v57, %s3726_s16 }
 0xbea   :  { %v1115_v58 = vpop.permute.xlu0 %1114 }
 0xbeb   :  { %v1190_v59 = vpop.permute.xlu1 %1189  ;;  %2976 = vmatmul.mubr.msk.f32.vlgmr.msra.gmra.mrb[12].mxu0 %vm158_vm1, %v1115_v58 }
 0xbec   :  { %2987 = vmatmul.mubr.msk.f32.vlgmr.msra.gmra.mrb[8].mxu1 %vm158_vm1, %v1190_v59  ;;  %3241 = vmatpush3.bf16.msra.mxu0 %v3955_v5 }
 0xbed   :  { %3242 = vmatprep.subr.bf16.mxu0 %v3722_v0  ;;  %2997 = vmatprep.mubr.msk.f32.mxu0 %vm3723_vm0, %v3724_v1 }
 0xbee   :  { %3247 = vmatpush3.bf16.msra.mxu1 %v3978_v31  ;;  %3008 = vmatprep.mubr.msk.f32.mxu1 %vm3723_vm0, %v3724_v1 }
 0xbef   :  { %3248 = vmatprep.subr.bf16.mxu1 %v3722_v0 }
 0xbf0   :  { %3244 = vmatpush3.bf16.msra.mxu0 %v3959_v8 }
 0xbf1   :  { %3251 = vmatprep.subr.bf16.mxu0 %v3722_v0 }
 0xbf2   :  { %3250 = vmatpush3.bf16.msra.mxu1 %v3982_v34 }
 0xbf3   :  { %2998 = vmatmul.mubr.msk.f32.vlgmr.msra.gmra.mrb[14].mxu0 %vm158_vm1, %v1190_v59  ;;  %3257 = vmatprep.subr.bf16.mxu1 %v3722_v0 }
 0xbf4   :  { %3253 = vmatpush3.bf16.msra.mxu0 %v3986_v37  ;;  %3019 = vmatprep.mubr.msk.f32.mxu0 %vm3723_vm0, %v3724_v1 }
 0xbf5   :  { %3254 = vmatprep.subr.bf16.mxu0 %v3722_v0 }
 0xbf8   :  { %3256 = vmatpush3.bf16.msra.mxu0 %v3992_v42 }
 0xbf9   :  { %3263 = vmatprep.subr.bf16.mxu0 %v3722_v0 }
 0xcbe   :  { %v1184_v60 = vpop.f32.mrb[12].mxu0 }
 0xcbf   :  { %v1259_v61 = vpop.f32.mrb[8].mxu1  ;;  %v2977_v62 = vpop.f32.mrb[13].mxu0 }
 0xcc0   :  { %v1260_v63 = vadd.f32 %v1259_v61, %v1184_v60  ;;  %v2988_v2 = vpop.f32.mrb[9].mxu1 }
 0xcc2   :  { %v1263_v3 = vadd.f32 %v1260_v63, %v4018_v51 }
 0xcc4   :  { %v2682_v4 = vmul.f32 -1.442695, %v1263_v3 }
 0xcc6   :  { %3402 = vpow2.f32 %v2682_v4  ;;  %v1357_v7 = vpop.f32.mrb[14].mxu0 }
 0xcc7   :  { %v1361_v9 = vadd.f32 %v1357_v7, %v1290_v6  ;;  %v2999_v10 = vpop.f32.mrb[15].mxu0 }
 0xcc9   :  { %v2685_v11 = vmul.f32 -1.442695, %v1361_v9 }
 0xccb   :  { %3404 = vpow2.f32 %v2685_v11 }
 0xcd0   :  { %v3403_v12 = vpop.eup %3402 }
 0xcd1   :  { %v1267_v13 = vadd.f32 1.0, %v3403_v12 }
 0xcd3   :  { %3406 = vrcp.f32 %v1267_v13 }
 0xcd5   :  { %v3405_v14 = vpop.eup %3404 }
 0xcd6   :  { %v1365_v15 = vadd.f32 1.0, %v3405_v14 }
 0xcd8   :  { %3408 = vrcp.f32 %v1365_v15 }
 0xcdd   :  { %v3407_v16 = vpop.eup %3406 }
 0xcde   :  { %v1270_v17 = vmul.f32 2.0, %v3407_v16  ;;  %v1272_v26 = vmul.f32 %v3407_v16, %v4103_v49  ;;  %v1564_v49 = vld [vmem:[#allocation4 + $0x28] sm:$0xff] }
 0xce0   :  { %v2683_v18 = vadd.f32 -1.0, %v1270_v17 }
 0xce2   :  { %v3409_v19 = vpop.eup %3408  ;;  %1274 = vrot.lane.b32.xlu0 %v2683_v18, %s3725_s9 }
 0xce3   :  { %v1368_v20 = vmul.f32 2.0, %v3409_v19  ;;  %v1370_v29 = vmul.f32 %v3409_v19, %v4105_v50 }
 0xce5   :  { %v2686_v21 = vadd.f32 -1.0, %v1368_v20 }
 0xce7   :  { %1372 = vrot.lane.b32.xlu1 %v2686_v21, %s3725_s9 }
 0xd54   :  { %v1275_v22 = vpop.permute.xlu0 %1274 }
 0xd55   :  { %v1277_v23 = vmul.f32 %v3407_v16, %v1275_v22 }
 0xd57   :  { %1279 = vrot.lane.b32.xlu0 %v1277_v23, %s3726_s16 }
 0xd59   :  { %v1373_v24 = vpop.permute.xlu1 %1372 }
 0xd5a   :  { %v1375_v25 = vmul.f32 %v3409_v19, %v1373_v24 }
 0xd5c   :  { %1377 = vrot.lane.b32.xlu1 %v1375_v25, %s3726_s16 }
 0xdc9   :  { %v1280_v27 = vpop.permute.xlu0 %1279 }
 0xdca   :  { %v4140_v28 = vadd.f32 %v1280_v27, %v1272_v26 }
 0xdcc   :  { %3410 = vtanh.f32 %v4140_v28 }
 0xdce   :  { %v1378_v30 = vpop.permute.xlu1 %1377 }
 0xdcf   :  { %v4144_v32 = vadd.f32 %v1378_v30, %v1370_v29 }
 0xdd1   :  { %3412 = vtanh.f32 %v4144_v32 }
 0xdd6   :  { %v3411_v33 = vpop.eup %3410 }
 0xdd7   :  { %1285 = vrot.lane.b32.xlu0 %v3411_v33, %s3725_s9  ;;  %v1838_v33 = vld [vmem:[#allocation4 + $0x30] sm:$0xff] }
 0xddb   :  { %v3413_v35 = vpop.eup %3412 }
 0xddc   :  { %1383 = vrot.lane.b32.xlu1 %v3413_v35, %s3725_s9 }
 0xe49   :  { %v1286_v36 = vpop.permute.xlu0 %1285 }
 0xe4a   :  { %v1288_v38 = vmul.f32 %v3407_v16, %v1286_v36 }
 0xe4c   :  { %1388 = vrot.lane.b32.xlu0 %v1288_v38, %s3726_s16 }
 0xe4e   :  { %v1384_v39 = vpop.permute.xlu1 %1383 }
 0xe4f   :  { %v1386_v40 = vmul.f32 %v3409_v19, %v1384_v39 }
 0xe51   :  { %1463 = vrot.lane.b32.xlu1 %v1386_v40, %s3726_s16 }
 0xebe   :  { %v1389_v41 = vpop.permute.xlu0 %1388 }
 0xebf   :  { %3009 = vmatmul.mubr.msk.f32.vlgmr.msra.gmra.mrb[10].mxu1 %vm158_vm1, %v1389_v41 }
 0xec0   :  { %3259 = vmatpush3.bf16.msra.mxu1 %v3955_v5  ;;  %3030 = vmatprep.mubr.msk.f32.mxu1 %vm3723_vm0, %v3724_v1 }
 0xec1   :  { %3260 = vmatprep.subr.bf16.mxu1 %v3722_v0 }
 0xec3   :  { %v1464_v43 = vpop.permute.xlu1 %1463 }
 0xec4   :  { %3262 = vmatpush3.bf16.msra.mxu1 %v3959_v8  ;;  %3020 = vmatmul.mubr.msk.f32.vlgmr.msra.gmra.mrb[16].mxu0 %vm158_vm1, %v1464_v43 }
 0xec5   :  { %3265 = vmatpush3.bf16.msra.mxu0 %v3978_v31  ;;  %3269 = vmatprep.subr.bf16.mxu1 %v3722_v0 }
 0xec6   :  { %3266 = vmatprep.subr.bf16.mxu0 %v3722_v0  ;;  %3041 = vmatprep.mubr.msk.f32.mxu0 %vm3723_vm0, %v3724_v1 }
 0xec7   :  { %3031 = vmatmul.mubr.msk.f32.vlgmr.msra.gmra.mrb[12].mxu1 %vm158_vm1, %v1464_v43 }
 0xec8   :  { %3271 = vmatpush3.bf16.msra.mxu1 %v3986_v37  ;;  %3052 = vmatprep.mubr.msk.f32.mxu1 %vm3723_vm0, %v3724_v1 }
 0xec9   :  { %3268 = vmatpush3.bf16.msra.mxu0 %v3982_v34  ;;  %3272 = vmatprep.subr.bf16.mxu1 %v3722_v0 }
 0xeca   :  { %3275 = vmatprep.subr.bf16.mxu0 %v3722_v0 }
 0xecc   :  { %3274 = vmatpush3.bf16.msra.mxu1 %v3992_v42 }
 0xecd   :  { %3281 = vmatprep.subr.bf16.mxu1 %v3722_v0 }
 0xf92   :  { %v1458_v44 = vpop.f32.mrb[10].mxu1 }
 0xf93   :  { %v3010_v45 = vpop.f32.mrb[11].mxu1 }
 0xf97   :  { %v1533_v46 = vpop.f32.mrb[16].mxu0 }
 0xf98   :  { %v1534_v47 = vadd.f32 %v1533_v46, %v1458_v44  ;;  %v3021_v48 = vpop.f32.mrb[17].mxu0 }
 0xf9a   :  { %v1537_v50 = vadd.f32 %v1534_v47, %v4018_v51  ;;  %v1631_v52 = vpop.f32.mrb[12].mxu1 }
 0xf9b   :  { %v1635_v53 = vadd.f32 %v1631_v52, %v1564_v49  ;;  %v3032_v54 = vpop.f32.mrb[13].mxu1 }
 0xf9c   :  { %v2689_v55 = vmul.f32 -1.442695, %v1537_v50 }
 0xf9d   :  { %v2692_v56 = vmul.f32 -1.442695, %v1635_v53 }
 0xf9e   :  { %3414 = vpow2.f32 %v2689_v55 }
 0xf9f   :  { %3416 = vpow2.f32 %v2692_v56 }
 0xfa8   :  { %v3415_v57 = vpop.eup %3414 }
 0xfa9   :  { %v3417_v58 = vpop.eup %3416  ;;  %v1541_v59 = vadd.f32 1.0, %v3415_v57 }
 0xfaa   :  { %v1639_v60 = vadd.f32 1.0, %v3417_v58 }
 0xfab   :  { %3418 = vrcp.f32 %v1541_v59 }
 0xfac   :  { %3420 = vrcp.f32 %v1639_v60 }
 0xfb5   :  { %v3419_v61 = vpop.eup %3418 }
 0xfb6   :  { %v3421_v62 = vpop.eup %3420  ;;  %v1544_v63 = vmul.f32 2.0, %v3419_v61  ;;  %v1546_v11 = vmul.f32 %v3419_v61, %v4140_v28 }
 0xfb7   :  { %v1642_v2 = vmul.f32 2.0, %v3421_v62  ;;  %v1644_v12 = vmul.f32 %v3421_v62, %v4144_v32 }
 0xfb8   :  { %v2690_v3 = vadd.f32 -1.0, %v1544_v63 }
 0xfb9   :  { %v2693_v4 = vadd.f32 -1.0, %v1642_v2 }
 0xfba   :  { %1548 = vrot.lane.b32.xlu0 %v2690_v3, %s3725_s9 }
 0xfbb   :  { %1646 = vrot.lane.b32.xlu1 %v2693_v4, %s3725_s9 }
0x102c   :  { %v1549_v6 = vpop.permute.xlu0 %1548 }
0x102d   :  { %v1647_v7 = vpop.permute.xlu1 %1646  ;;  %v1551_v9 = vmul.f32 %v3419_v61, %v1549_v6 }
0x102e   :  { %v1649_v10 = vmul.f32 %v3421_v62, %v1647_v7 }
0x102f   :  { %1553 = vrot.lane.b32.xlu0 %v1551_v9, %s3726_s16 }
0x1030   :  { %1651 = vrot.lane.b32.xlu1 %v1649_v10, %s3726_s16 }
0x10a1   :  { %v1554_v13 = vpop.permute.xlu0 %1553 }
0x10a2   :  { %v1652_v14 = vpop.permute.xlu1 %1651  ;;  %v4179_v15 = vadd.f32 %v1554_v13, %v1546_v11 }
0x10a3   :  { %v4181_v16 = vadd.f32 %v1652_v14, %v1644_v12  ;;  %v2112_v12 = vld [vmem:[#allocation4 + $0x38] sm:$0xff] }
0x10a4   :  { %3422 = vtanh.f32 %v4179_v15 }
0x10a5   :  { %3424 = vtanh.f32 %v4181_v16 }
0x10ae   :  { %v3423_v17 = vpop.eup %3422 }
0x10af   :  { %v3425_v18 = vpop.eup %3424  ;;  %1559 = vrot.lane.b32.xlu0 %v3423_v17, %s3725_s9 }
0x10b0   :  { %1657 = vrot.lane.b32.xlu1 %v3425_v18, %s3725_s9 }
0x1121   :  { %v1560_v19 = vpop.permute.xlu0 %1559 }
0x1122   :  { %v1658_v20 = vpop.permute.xlu1 %1657  ;;  %v1562_v21 = vmul.f32 %v3419_v61, %v1560_v19 }
0x1123   :  { %v1660_v22 = vmul.f32 %v3421_v62, %v1658_v20 }
0x1124   :  { %1662 = vrot.lane.b32.xlu0 %v1562_v21, %s3726_s16 }
0x1125   :  { %1737 = vrot.lane.b32.xlu1 %v1660_v22, %s3726_s16 }
0x1196   :  { %v1663_v23 = vpop.permute.xlu0 %1662 }
0x1197   :  { %v1738_v24 = vpop.permute.xlu1 %1737  ;;  %3042 = vmatmul.mubr.msk.f32.vlgmr.msra.gmra.mrb[18].mxu0 %vm158_vm1, %v1663_v23 }
0x1198   :  { %3053 = vmatmul.mubr.msk.f32.vlgmr.msra.gmra.mrb[14].mxu1 %vm158_vm1, %v1738_v24  ;;  %3277 = vmatpush3.bf16.msra.mxu0 %v3955_v5 }
0x1199   :  { %3278 = vmatprep.subr.bf16.mxu0 %v3722_v0  ;;  %3063 = vmatprep.mubr.msk.f32.mxu0 %vm3723_vm0, %v3724_v1 }
0x119a   :  { %3283 = vmatpush3.bf16.msra.mxu1 %v3978_v31  ;;  %3074 = vmatprep.mubr.msk.f32.mxu1 %vm3723_vm0, %v3724_v1 }
0x119b   :  { %3284 = vmatprep.subr.bf16.mxu1 %v3722_v0 }
0x119c   :  { %3280 = vmatpush3.bf16.msra.mxu0 %v3959_v8 }
0x119d   :  { %3287 = vmatprep.subr.bf16.mxu0 %v3722_v0 }
0x119e   :  { %3286 = vmatpush3.bf16.msra.mxu1 %v3982_v34 }
0x119f   :  { %3064 = vmatmul.mubr.msk.f32.vlgmr.msra.gmra.mrb[20].mxu0 %vm158_vm1, %v1738_v24  ;;  %3293 = vmatprep.subr.bf16.mxu1 %v3722_v0 }
0x11a0   :  { %3289 = vmatpush3.bf16.msra.mxu0 %v3986_v37  ;;  %3085 = vmatprep.mubr.msk.f32.mxu0 %vm3723_vm0, %v3724_v1 }
0x11a1   :  { %3290 = vmatprep.subr.bf16.mxu0 %v3722_v0 }
0x11a4   :  { %3292 = vmatpush3.bf16.msra.mxu0 %v3992_v42 }
0x11a5   :  { %3299 = vmatprep.subr.bf16.mxu0 %v3722_v0 }
0x126a   :  { %v1732_v25 = vpop.f32.mrb[18].mxu0 }
0x126b   :  { %v1807_v26 = vpop.f32.mrb[14].mxu1  ;;  %v3043_v27 = vpop.f32.mrb[19].mxu0 }
0x126c   :  { %v1808_v28 = vadd.f32 %v1807_v26, %v1732_v25  ;;  %v3054_v29 = vpop.f32.mrb[15].mxu1 }
0x126e   :  { %v1811_v30 = vadd.f32 %v1808_v28, %v4018_v51 }
0x1270   :  { %v2696_v32 = vmul.f32 -1.442695, %v1811_v30 }
0x1272   :  { %3426 = vpow2.f32 %v2696_v32  ;;  %v1905_v35 = vpop.f32.mrb[20].mxu0 }
0x1273   :  { %v1909_v36 = vadd.f32 %v1905_v35, %v1838_v33  ;;  %v3065_v38 = vpop.f32.mrb[21].mxu0 }
0x1275   :  { %v2699_v39 = vmul.f32 -1.442695, %v1909_v36 }
0x1277   :  { %3428 = vpow2.f32 %v2699_v39 }
0x127c   :  { %v3427_v40 = vpop.eup %3426 }
0x127d   :  { %v1815_v41 = vadd.f32 1.0, %v3427_v40 }
0x127f   :  { %3430 = vrcp.f32 %v1815_v41 }
0x1281   :  { %v3429_v43 = vpop.eup %3428 }
0x1282   :  { %v1913_v44 = vadd.f32 1.0, %v3429_v43 }
0x1284   :  { %3432 = vrcp.f32 %v1913_v44 }
0x1289   :  { %v3431_v45 = vpop.eup %3430 }
0x128a   :  { %v1818_v46 = vmul.f32 2.0, %v3431_v45  ;;  %v1820_v56 = vmul.f32 %v3431_v45, %v4179_v15 }
0x128c   :  { %v2697_v47 = vadd.f32 -1.0, %v1818_v46 }
0x128e   :  { %v3433_v48 = vpop.eup %3432  ;;  %1822 = vrot.lane.b32.xlu0 %v2697_v47, %s3725_s9 }
0x128f   :  { %v1916_v49 = vmul.f32 2.0, %v3433_v48  ;;  %v1918_v59 = vmul.f32 %v3433_v48, %v4181_v16 }
0x1291   :  { %v2700_v50 = vadd.f32 -1.0, %v1916_v49 }
0x1293   :  { %1920 = vrot.lane.b32.xlu1 %v2700_v50, %s3725_s9 }
0x1300   :  { %v1823_v52 = vpop.permute.xlu0 %1822 }
0x1301   :  { %v1825_v53 = vmul.f32 %v3431_v45, %v1823_v52 }
0x1303   :  { %1827 = vrot.lane.b32.xlu0 %v1825_v53, %s3726_s16 }
0x1305   :  { %v1921_v54 = vpop.permute.xlu1 %1920 }
0x1306   :  { %v1923_v55 = vmul.f32 %v3433_v48, %v1921_v54 }
0x1308   :  { %1925 = vrot.lane.b32.xlu1 %v1923_v55, %s3726_s16 }
0x1375   :  { %v1828_v57 = vpop.permute.xlu0 %1827 }
0x1376   :  { %v4216_v58 = vadd.f32 %v1828_v57, %v1820_v56 }
0x1378   :  { %3434 = vtanh.f32 %v4216_v58 }
0x137a   :  { %v1926_v60 = vpop.permute.xlu1 %1925 }
0x137b   :  { %v4220_v61 = vadd.f32 %v1926_v60, %v1918_v59 }
0x137d   :  { %3436 = vtanh.f32 %v4220_v61 }
0x1382   :  { %v3435_v62 = vpop.eup %3434 }
0x1383   :  { %1833 = vrot.lane.b32.xlu0 %v3435_v62, %s3725_s9 }
0x1387   :  { %v3437_v63 = vpop.eup %3436 }
0x1388   :  { %1931 = vrot.lane.b32.xlu1 %v3437_v63, %s3725_s9 }
0x13f5   :  { %v1834_v2 = vpop.permute.xlu0 %1833 }
0x13f6   :  { %v1836_v3 = vmul.f32 %v3431_v45, %v1834_v2 }
0x13f8   :  { %1936 = vrot.lane.b32.xlu0 %v1836_v3, %s3726_s16  ;;  %v2428_v3 = vld [vmem:[#allocation15] sm:$0xff] }
0x13fa   :  { %v1932_v4 = vpop.permute.xlu1 %1931 }
0x13fb   :  { %v1934_v6 = vmul.f32 %v3433_v48, %v1932_v4  ;;  %v2430_v4 = vld [vmem:[#allocation15 + $0x10] sm:$0xff] }
0x13fd   :  { %2011 = vrot.lane.b32.xlu1 %v1934_v6, %s3726_s16 }
0x146a   :  { %v1937_v7 = vpop.permute.xlu0 %1936 }
0x146b   :  { %3075 = vmatmul.mubr.msk.f32.vlgmr.msra.gmra.mrb[16].mxu1 %vm158_vm1, %v1937_v7  ;;  %v2431_v7 = vld [vmem:[#allocation15 + $0x18] sm:$0xff] }
0x146c   :  { %3295 = vmatpush3.bf16.msra.mxu1 %v3955_v5  ;;  %3096 = vmatprep.mubr.msk.f32.mxu1 %vm3723_vm0, %v3724_v1 }
0x146d   :  { %3296 = vmatprep.subr.bf16.mxu1 %v3722_v0 }
0x146f   :  { %v2012_v9 = vpop.permute.xlu1 %2011 }
0x1470   :  { %3298 = vmatpush3.bf16.msra.mxu1 %v3959_v8  ;;  %3086 = vmatmul.mubr.msk.f32.vlgmr.msra.gmra.mrb[22].mxu0 %vm158_vm1, %v2012_v9 }
0x1471   :  { %3305 = vmatprep.subr.bf16.mxu1 %v3722_v0  ;;  %3301 = vmatpush3.bf16.msra.mxu0 %v3978_v31 }
0x1472   :  { %3302 = vmatprep.subr.bf16.mxu0 %v3722_v0  ;;  %3107 = vmatprep.mubr.msk.f32.mxu0 %vm3723_vm0, %v3724_v1 }
0x1473   :  { %3097 = vmatmul.mubr.msk.f32.vlgmr.msra.gmra.mrb[18].mxu1 %vm158_vm1, %v2012_v9  ;;  %v3315_v9 = vpack.c.bf16 %v2431_v7, %v2430_v4 }
0x1474   :  { %3307 = vmatpush3.bf16.msra.mxu1 %v3986_v37  ;;  %3118 = vmatprep.mubr.msk.f32.mxu1 %vm3723_vm0, %v3724_v1 }
0x1475   :  { %3308 = vmatprep.subr.bf16.mxu1 %v3722_v0  ;;  %3304 = vmatpush3.bf16.msra.mxu0 %v3982_v34 }
0x1476   :  { %3311 = vmatprep.subr.bf16.mxu0 %v3722_v0 }
0x1478   :  { %3310 = vmatpush3.bf16.msra.mxu1 %v3992_v42 }
0x1479   :  { %3317 = vmatprep.subr.bf16.mxu1 %v3722_v0 }
0x153e   :  { %v2006_v5 = vpop.f32.mrb[16].mxu1 }
0x153f   :  { %v3076_v8 = vpop.f32.mrb[17].mxu1 }
0x1540   :  { %v2512_v8 = vld [vmem:[#allocation16] sm:$0xff] }
0x1543   :  { %v2081_v31 = vpop.f32.mrb[22].mxu0 }
0x1544   :  { %v2082_v10 = vadd.f32 %v2081_v31, %v2006_v5  ;;  %v3087_v11 = vpop.f32.mrb[23].mxu0  ;;  %v2513_v31 = vld [vmem:[#allocation16 + $0x8] sm:$0xff] }
0x1545   :  { %v3318_v11 = vpack.c.bf16 %v2513_v31, %v2512_v8 }
0x1546   :  { %v2085_v37 = vadd.f32 %v2082_v10, %v4018_v51  ;;  %v2179_v13 = vpop.f32.mrb[18].mxu1  ;;  %v2514_v10 = vld [vmem:[#allocation16 + $0x10] sm:$0xff] }
0x1547   :  { %v2183_v14 = vadd.f32 %v2179_v13, %v2112_v12  ;;  %v3098_v15 = vpop.f32.mrb[19].mxu1  ;;  %v2515_v12 = vld [vmem:[#allocation16 + $0x18] sm:$0xff]  ;;  %v2516_v13 = vld [vmem:[#allocation16 + $0x20] sm:$0xff] }
0x1548   :  { %v2703_v16 = vmul.f32 -1.442695, %v2085_v37  ;;  %v3321_v37 = vpack.c.bf16 %v2515_v12, %v2514_v10 }
0x1549   :  { %v2706_v17 = vmul.f32 -1.442695, %v2183_v14  ;;  %v2517_v14 = vld [vmem:[#allocation16 + $0x28] sm:$0xff] }
0x154a   :  { %3438 = vpow2.f32 %v2703_v16 }
0x154b   :  { %3440 = vpow2.f32 %v2706_v17  ;;  %v3324_v17 = vpack.c.bf16 %v2517_v14, %v2516_v13 }
0x1554   :  { %v3439_v34 = vpop.eup %3438 }
0x1555   :  { %v3441_v18 = vpop.eup %3440  ;;  %v2089_v42 = vadd.f32 1.0, %v3439_v34  ;;  %v2518_v34 = vld [vmem:[#allocation16 + $0x30] sm:$0xff] }
0x1556   :  { %v2187_v19 = vadd.f32 1.0, %v3441_v18  ;;  %v2519_v18 = vld [vmem:[#allocation16 + $0x38] sm:$0xff] }
0x1557   :  { %3442 = vrcp.f32 %v2089_v42 }
0x1558   :  { %3444 = vrcp.f32 %v2187_v19  ;;  %v3327_v19 = vpack.c.bf16 %v2519_v18, %v2518_v34 }
0x1561   :  { %v3443_v20 = vpop.eup %3442 }
0x1562   :  { %v3445_v21 = vpop.eup %3444  ;;  %v2092_v22 = vmul.f32 2.0, %v3443_v20  ;;  %v2094_v30 = vmul.f32 %v3443_v20, %v4216_v58 }
0x1563   :  { %v2190_v23 = vmul.f32 2.0, %v3445_v21  ;;  %v2192_v32 = vmul.f32 %v3445_v21, %v4220_v61 }
0x1564   :  { %v2704_v24 = vadd.f32 -1.0, %v2092_v22 }
0x1565   :  { %v2707_v25 = vadd.f32 -1.0, %v2190_v23  ;;  %v2522_v23 = vld [vmem:[#allocation16 + $0x50] sm:$0xff] }
0x1566   :  { %2096 = vrot.lane.b32.xlu0 %v2704_v24, %s3725_s9  ;;  %v2523_v24 = vld [vmem:[#allocation16 + $0x58] sm:$0xff] }
0x1567   :  { %2194 = vrot.lane.b32.xlu1 %v2707_v25, %s3725_s9  ;;  %v3333_v25 = vpack.c.bf16 %v2523_v24, %v2522_v23 }
0x15d8   :  { %v2097_v26 = vpop.permute.xlu0 %2096 }
0x15d9   :  { %v2195_v27 = vpop.permute.xlu1 %2194  ;;  %v2099_v28 = vmul.f32 %v3443_v20, %v2097_v26  ;;  %v2524_v26 = vld [vmem:[#allocation16 + $0x60] sm:$0xff] }
0x15da   :  { %v2197_v29 = vmul.f32 %v3445_v21, %v2195_v27  ;;  %v2525_v27 = vld [vmem:[#allocation16 + $0x68] sm:$0xff] }
0x15db   :  { %2101 = vrot.lane.b32.xlu0 %v2099_v28, %s3726_s16  ;;  %v3336_v28 = vpack.c.bf16 %v2525_v27, %v2524_v26 }
0x15dc   :  { %2199 = vrot.lane.b32.xlu1 %v2197_v29, %s3726_s16 }
0x164d   :  { %v2102_v33 = vpop.permute.xlu0 %2101 }
0x164e   :  { %v2200_v35 = vpop.permute.xlu1 %2199  ;;  %v2104_v36 = vadd.f32 %v2102_v33, %v2094_v30  ;;  %v2527_v33 = vld [vmem:[#allocation16 + $0x78] sm:$0xff] }
0x164f   :  { %v2202_v38 = vadd.f32 %v2200_v35, %v2192_v32  ;;  %v2526_v32 = vld [vmem:[#allocation16 + $0x70] sm:$0xff] }
0x1650   :  { %3446 = vtanh.f32 %v2104_v36  ;;  %v3339_v35 = vpack.c.bf16 %v2527_v33, %v2526_v32 }
0x1651   :  { %3448 = vtanh.f32 %v2202_v38 }
0x165a   :  { %v3447_v39 = vpop.eup %3446 }
0x165b   :  { %v3449_v40 = vpop.eup %3448  ;;  %2107 = vrot.lane.b32.xlu0 %v3447_v39, %s3725_s9 }
0x165c   :  { %2205 = vrot.lane.b32.xlu1 %v3449_v40, %s3725_s9 }
0x16cd   :  { %v2108_v41 = vpop.permute.xlu0 %2107 }
0x16ce   :  { %v2206_v43 = vpop.permute.xlu1 %2205  ;;  %v2110_v44 = vmul.f32 %v3443_v20, %v2108_v41  ;;  %v2520_v20 = vld [vmem:[#allocation16 + $0x40] sm:$0xff] }
0x16cf   :  { %v2208_v45 = vmul.f32 %v3445_v21, %v2206_v43  ;;  %v2521_v21 = vld [vmem:[#allocation16 + $0x48] sm:$0xff] }
0x16d0   :  { %2210 = vrot.lane.b32.xlu0 %v2110_v44, %s3726_s16  ;;  %v3330_v22 = vpack.c.bf16 %v2521_v21, %v2520_v20 }
0x16d1   :  { %2285 = vrot.lane.b32.xlu1 %v2208_v45, %s3726_s16 }
0x1742   :  { %v2211_v46 = vpop.permute.xlu0 %2210 }
0x1743   :  { %v2286_v47 = vpop.permute.xlu1 %2285  ;;  %3108 = vmatmul.mubr.msk.f32.vlgmr.msra.gmra.mrb[24].mxu0 %vm158_vm1, %v2211_v46 }
0x1744   :  { %2410 = vst.msk [vmem:[#allocation19] sm:$0xff] %vm158_vm1, %v2286_v47  ;;  %3119 = vmatmul.mubr.msk.f32.vlgmr.msra.gmra.mrb[20].mxu1 %vm158_vm1, %v2286_v47  ;;  %3129 = vmatprep.mubr.msk.f32.mxu0 %vm3723_vm0, %v3724_v1 }
0x1745   :  { %3164 = vmatprep.mubr.msk.f32.mxu1 %vm3723_vm0, %v3724_v1  ;;  %3319 = vmatpush3.bf16.msra.mxu1 %v3318_v11 }
0x1746   :  { %3320 = vmatprep.subr.bf16.mxu1 %v3722_v0 }
0x1749   :  { %3322 = vmatpush3.bf16.msra.mxu1 %v3321_v37 }
0x174a   :  { %3323 = vmatprep.subr.bf16.mxu1 %v3722_v0 }
0x174d   :  { %3325 = vmatpush3.bf16.msra.mxu1 %v3324_v17 }
0x174e   :  { %3326 = vmatprep.subr.bf16.mxu1 %v3722_v0 }
0x1751   :  { %3328 = vmatpush3.bf16.msra.mxu1 %v3327_v19 }
0x1752   :  { %3329 = vmatprep.subr.bf16.mxu1 %v3722_v0 }
0x1755   :  { %3331 = vmatpush3.bf16.msra.mxu1 %v3330_v22 }
0x1756   :  { %3332 = vmatprep.subr.bf16.mxu1 %v3722_v0 }
0x1759   :  { %3334 = vmatpush3.bf16.msra.mxu1 %v3333_v25 }
0x175a   :  { %3335 = vmatprep.subr.bf16.mxu1 %v3722_v0 }
0x175d   :  { %3337 = vmatpush3.bf16.msra.mxu1 %v3336_v28 }
0x175e   :  { %3338 = vmatprep.subr.bf16.mxu1 %v3722_v0 }
0x1761   :  { %3340 = vmatpush3.bf16.msra.mxu1 %v3339_v35 }
0x1816   :  { %v2280_v48 = vpop.f32.mrb[24].mxu0 }
0x1817   :  { %v2355_v49 = vpop.f32.mrb[20].mxu1  ;;  %v3109_v50 = vpop.f32.mrb[25].mxu0 }
0x1818   :  { %v2356_v52 = vadd.f32 %v2355_v49, %v2280_v48  ;;  %v3120_v53 = vpop.f32.mrb[21].mxu1 }
0x181a   :  { %v2359_v54 = vadd.f32 %v2356_v52, %v4018_v51  ;;  %v2429_v51 = vld [vmem:[#allocation15 + $0x8] sm:$0xff] }
0x181b   :  { %v3312_v6 = vpack.c.bf16 %v2429_v51, %v2428_v3 }
0x181c   :  { %v2710_v55 = vmul.f32 -1.442695, %v2359_v54 }
0x181d   :  { %3313 = vmatpush3.bf16.msra.mxu0 %v3312_v6 }
0x181e   :  { %3450 = vpow2.f32 %v2710_v55  ;;  %3314 = vmatprep.subr.bf16.mxu0 %v3722_v0 }
0x1821   :  { %3316 = vmatpush3.bf16.msra.mxu0 %v3315_v9 }
0x1828   :  { %v3451_v56 = vpop.eup %3450 }
0x1829   :  { %v2363_v57 = vadd.f32 1.0, %v3451_v56 }
0x182b   :  { %3452 = vrcp.f32 %v2363_v57 }
0x1835   :  { %v3453_v58 = vpop.eup %3452 }
0x1836   :  { %v2366_v59 = vmul.f32 2.0, %v3453_v58  ;;  %v2368_v1 = vmul.f32 %v3453_v58, %v2104_v36  ;;  %v2712_v36 = vld [vmem:[%s4339_s8] ss:$0 sm:$0xff] }
0x1838   :  { %v2711_v60 = vadd.f32 -1.0, %v2366_v59 }
0x183a   :  { %2370 = vrot.lane.b32.xlu0 %v2711_v60, %s3725_s9 }
0x18ac   :  { %v2371_v61 = vpop.permute.xlu0 %2370 }
0x18ad   :  { %v2373_v62 = vmul.f32 %v3453_v58, %v2371_v61 }
0x18af   :  { %2375 = vrot.lane.b32.xlu1 %v2373_v62, %s3726_s16 }
0x1921   :  { %v2376_v63 = vpop.permute.xlu1 %2375 }
0x1922   :  { %v2378_v2 = vadd.f32 %v2376_v63, %v2368_v1 }
0x1924   :  { %3454 = vtanh.f32 %v2378_v2 }
0x192e   :  { %v3455_v5 = vpop.eup %3454 }
0x192f   :  { %2381 = vrot.lane.b32.xlu0 %v3455_v5, %s3725_s9 }
0x1933   :  { %2412 = vrot.lane.b32.xlu0 %v2202_v38, %s3727_s6 }
0x19a1   :  { %v2382_v15 = vpop.permute.xlu0 %2381 }
0x19a2   :  { %v2384_v16 = vmul.f32 %v3453_v58, %v2382_v15 }
0x19a4   :  { %2417 = vrot.lane.b32.xlu1 %v2384_v16, %s3726_s16 }
0x19a5   :  { %v2413_v42 = vpop.permute.xlu0 %2412 }
0x19a6   :  { %2415 = vst.msk [vmem:[#allocation21] sm:$0xff] %vm158_vm1, %v2413_v42 }
0x19a8   :  { %2423 = vrot.lane.b32.xlu1 %v2378_v2, %s3727_s6 }
0x1a16   :  { %v2418_v29 = vpop.permute.xlu1 %2417 }
0x1a17   :  { %2421 = vst.msk [vmem:[#allocation19 + $0x8] sm:$0xff] %vm158_vm1, %v2418_v29  ;;  %3130 = vmatmul.mubr.msk.f32.vlgmr.msra.gmra.mrb[26].mxu0 %vm158_vm1, %v2418_v29 }
0x1a1a   :  { %v2424_v30 = vpop.permute.xlu1 %2423 }
0x1a1b   :  { %2427 = vst.msk [vmem:[#allocation21 + $0x8] sm:$0xff] %vm158_vm1, %v2424_v30 }
0x1aea   :  { %v2507_v38 = vpop.f32.mrb[26].mxu0 }
0x1aeb   :  { %v2508_v39 = vadd.f32 %v2712_v36, %v2507_v38  ;;  %v3131_v40 = vpop.f32.mrb[27].mxu0 }
0x1aed   :  { %v2511_v0 = vmax.f32 %v2508_v39, 0.0 }
0x1aef   :  { %3165 = vmatmul.mubr.f32.vlgmr.msra.gmra.mrb[22].mxu1 %v2511_v0 }
0x1af0   :  { %3643 = shalt.err (!%p3640_p12)
}
0x1af1   :  { %s3644_s14 = scalar_lea.hbm %s4343_s12, 256 }
0x1af2   :  { %p3645_p13 = scmp.ne.s32.totalorder %s4343_s12, %s3644_s14  ;;  %p3648_p0 = scmp.lt.u32.totalorder %s3644_s14, %s4343_s12 }
0x1af4   :  { %p3650_p1 = pnand %p3648_p0, %p3645_p13 }
0x1af6   :  { %3653 = shalt.err (!%p3650_p1)
}
0x1af7   :  { %2627 = dma.vmem_to_hbm [thread:$0]  %s2622_s19, 256, %s4343_s12, [#allocation20], %s3714_s20, %s3714_s20, %s3715_s21  }
0x1af8   :  { %s3729_s3 = smov [#allocation21]  }
0x1af9   :  { %s2633_s2 = sshll.u32 %s3729_s3, 4  ;;  %s2634_s2 = int_to_ptr.vmem [resolvable:$true] %s2633_s2 }
0x1afa   :  { %s3654_s29 = scalar_lea.vmem %s2634_s2, 256  ;;  %p3659_p3 = scmp.lt.s32.totalorder %s2634_s2, %s2634_s2 }
0x1afb   :  { %p3655_p2 = scmp.ne.s32.totalorder %s2634_s2, %s3654_s29  ;;  %p3660_p4 = scmp.lt.s32.totalorder %s3654_s29, %s3654_s29 }
0x1afd   :  { %p3661_p5 = por %p3660_p4, %p3659_p3 }
0x1aff   :  { %p3662_p6 = pnand %p3661_p5, %p3655_p2 }
0x1b01   :  { %3665 = shalt.err (!%p3662_p6)
}
0x1b02   :  { %s3666_s15 = scalar_lea.hbm %s4344_s13, 256 }
0x1b03   :  { %p3667_p7 = scmp.ne.s32.totalorder %s4344_s13, %s3666_s15  ;;  %p3670_p8 = scmp.lt.u32.totalorder %s3666_s15, %s4344_s13 }
0x1b05   :  { %p3672_p9 = pnand %p3670_p8, %p3667_p7 }
0x1b07   :  { %3675 = shalt.err (!%p3672_p9)
}
0x1b08   :  { %2639 = dma.vmem_to_hbm [thread:$0]  %s2634_s2, 256, %s4344_s13, [#allocation20], %s3714_s20, %s3714_s20, %s3715_s21  }
0x1b09   :  { %v2714_v41 = vld [vmem:[%s4341_s10] ss:$0 sm:$0xff]  ;;  %s3730_s22 = smov [#allocation18]  }
0x1b0a   :  { %s2612_s19 = sshll.u32 %s3730_s22, 4  ;;  %s2613_s19 = int_to_ptr.vmem [resolvable:$true] %s2612_s19 }
0x1b0b   :  { %s3676_s23 = scalar_lea.vmem %s2613_s19, 128  ;;  %p3681_p11 = scmp.lt.s32.totalorder %s2613_s19, %s2613_s19 }
0x1b0c   :  { %p3677_p10 = scmp.ne.s32.totalorder %s2613_s19, %s3676_s23  ;;  %p3682_p12 = scmp.lt.s32.totalorder %s3676_s23, %s3676_s23 }
0x1b0e   :  { %p3683_p13 = por %p3682_p12, %p3681_p11 }
0x1b10   :  { %p3684_p0 = pnand %p3683_p13, %p3677_p10 }
0x1bc2   :  { %v2601_v43 = vpop.f32.mrb[22].mxu1 }
0x1bc3   :  { %v2602_v44 = vadd.f32 %v2714_v41, %v2601_v43  ;;  %v3166_v45 = vpop.f32.mrb[23].mxu1 }
0x1bc5   :  { %2605 = vst [vmem:[#allocation18] sm:$0xff] %v2602_v44 }
0x1bc6   :  { %3687 = shalt.err (!%p3684_p0)
}
0x1bc7   :  { %s3688_s20 = scalar_lea.hbm %s4342_s11, 128 }
0x1bc8   :  { %p3689_p1 = scmp.ne.s32.totalorder %s4342_s11, %s3688_s20  ;;  %p3692_p2 = scmp.lt.u32.totalorder %s3688_s20, %s4342_s11 }
0x1bca   :  { %p3694_p3 = pnand %p3692_p2, %p3689_p1 }
0x1bcc   :  { %3697 = shalt.err (!%p3694_p3)
}
0x1bcd   :  { %2615 = dma.vmem_to_hbm [thread:$0]  %s2613_s19, 128, %s4342_s11, [#allocation6]  }
0x1bce   :  { %3708 = dma.done.wait [#allocation6], 128  }
0x1bcf   :  { %3709 = vsyncadd [#allocation6], 4294967168 }
0x1bd0   :  { %3710 = dma.done.wait [#allocation20], 512  }
0x1bd1   :  { %3711 = vsyncadd [#allocation20], 4294966784 }
0x1bd2   :  { %2649 = vsyncpa [#allocation5], 1 }
0x1bd3   :  { %2650 = vsyncpa [#allocation8], 1 }
0x1bd4   :  { %2651 = vsyncpa [#allocation11], 1 }
0x1bd5   :  { %2652 = vsyncpa [#allocation14], 1 }
0x1bd6   :  { %2653 = vsyncpa [#allocation17], 1 }
0x1bd7   :  { %2654 = vsyncpa [#allocation6], 1 }
0x1bd8   :  { %2655 = vsyncpa [#allocation20], 1 }

</bundles_post_ra>
